<compile_context>
chip_gen: v6e
topology: v6e:2x2x1
jax: 0.10.0
libtpu: 0.0.40
codegen_flags: <defaults>
</compile_context>

<pallas_src>
import jax
import jax.numpy as jnp
from jax import lax
from jax.experimental import pallas as pl
from jax.experimental.pallas import tpu as pltpu

DEPTHS = (3, 3, 27, 3)          # convnext_base
DIMS = (128, 256, 512, 1024)    # convnext_base
LN_EPS = 1e-6
LAYER_SCALE_INIT = 1e-6
_SQRT_2_OVER_PI = 0.7978845608028654
_MB = 1024 * 1024


def _round_up(x, m):
    return ((x + m - 1) // m) * m


def _vmem_limit(nbytes):
    # explicit per-kernel cap with headroom; clipped so it is sane on
    # v5e/v6e (128 MiB physical) and v7x (64 MiB physical).
    return int(min(max(nbytes, 32 * _MB), 100 * _MB))


def _gelu(x):
    # TODO(synk): nn.GELU default is exact erf-GELU; tanh approximation used
    # (no guaranteed Mosaic erf lowering); deviation ~1e-3, same formula used
    # in the in-script reference.
    return 0.5 * x * (1.0 + jnp.tanh(_SQRT_2_OVER_PI * (x + 0.044715 * x * x * x)))


# ----------------------------------------------------------------------------
# Kernels
# ----------------------------------------------------------------------------
def _stem_kernel(x_ref, w_ref, b_ref, g_ref, beta_ref, o_ref):
    # patchified 4x4 conv as matmul (bf16 operands, f32 acc) + LayerNorm2d
    # epilogue over the full output channel dim.
    x = x_ref[...].astype(jnp.bfloat16)
    y = jnp.dot(x, w_ref[...], preferred_element_type=jnp.float32) + b_ref[...]
    mean = jnp.mean(y, axis=-1, keepdims=True)
    var = jnp.mean((y - mean) ** 2, axis=-1, keepdims=True)
    o_ref[...] = ((y - mean) * lax.rsqrt(var + LN_EPS) * g_ref[...]
                  + beta_ref[...]).astype(o_ref.dtype)


def _down_kernel(x_ref, g_ref, beta_ref, w_ref, b_ref, o_ref):
    # Downsample: LayerNorm2d (applied per 2x2-patch position, i.e. per
    # contiguous Cp-wide lane group of the patchified row) fused with the
    # 2x2/stride-2 conv expressed as a matmul (bf16 operands, f32 acc).
    x = x_ref[...]
    Cp = g_ref.shape[-1]
    parts = []
    for gi in range(4):                       # 2x2 patch -> 4 channel groups
        seg = x[:, gi * Cp:(gi + 1) * Cp]
        m = jnp.mean(seg, axis=-1, keepdims=True)
        v = jnp.mean((seg - m) ** 2, axis=-1, keepdims=True)
        parts.append((seg - m) * lax.rsqrt(v + LN_EPS) * g_ref[...] + beta_ref[...])
    t = jnp.concatenate(parts, axis=-1).astype(jnp.bfloat16)
    o_ref[...] = (jnp.dot(t, w_ref[...], preferred_element_type=jnp.float32)
                  + b_ref[...]).astype(o_ref.dtype)


def _dwconv7_kernel(xp_ref, k_ref, b_ref, o_ref):
    # Depthwise 7x7 on a zero-padded (H+6, W+6, CT) slab, channels on lanes.
    # One row-slab load per kh; the 7 kw shifts are value slices (VPU/XLU),
    # not separate unaligned ref loads.  f32 compute (safe on v5e too).
    H, W, C = o_ref.shape
    acc = jnp.zeros((H, W, C), jnp.float32)
    for kh in range(7):
        slab = xp_ref[kh:kh + H, :, :]                       # (H, W+6, C)
        for kw in range(7):
            tap = k_ref[kh * 7 + kw:kh * 7 + kw + 1, :]      # (1, C)
            acc = acc + slab[:, kw:kw + W, :] * tap
    o_ref[...] = (acc + b_ref[...]).astype(o_ref.dtype)


def _cnblock_kernel(y_ref, res_ref, g_ref, beta_ref, w1_ref, b1_ref,
                    w2_ref, b2_ref, ls_ref, o_ref, t_ref, acc_ref):
    # Fused CNBlock tail: LayerNorm -> Linear(C->4C) -> GELU -> Linear(4C->C)
    # -> layer_scale -> residual.  LN'd tile cached once per token tile in a
    # bf16 scratch; hidden dim optionally chunked on the "arbitrary" j axis
    # with an f32 accumulator.
    j = pl.program_id(1)

    @pl.when(j == 0)
    def _():
        y = y_ref[...]
        mean = jnp.mean(y, axis=-1, keepdims=True)
        var = jnp.mean((y - mean) ** 2, axis=-1, keepdims=True)
        t = (y - mean) * lax.rsqrt(var + LN_EPS) * g_ref[...] + beta_ref[...]
        t_ref[...] = t.astype(jnp.bfloat16)
        acc_ref[...] = jnp.zeros_like(acc_ref)

    h = jnp.dot(t_ref[...], w1_ref[...],
                preferred_element_type=jnp.float32) + b1_ref[...]
    h = _gelu(h)
    acc_ref[...] += jnp.dot(h.astype(jnp.bfloat16), w2_ref[...],
                            preferred_element_type=jnp.float32)

    @pl.when(j == pl.num_programs(1) - 1)
    def _():
        # TODO(synk): StochasticDepth is identity in eval mode; not applied.
        o_ref[...] = (res_ref[...] +
                      ls_ref[...] * (acc_ref[...] + b2_ref[...])
                      ).astype(o_ref.dtype)


def _head_kernel(x_ref, w_ref, b_ref, o_ref):
    # AdaptiveAvgPool2d(1) + Flatten + Dropout(0.2) + Linear for a batch tile.
    pooled = jnp.mean(x_ref[...], axis=1)                    # (NB, C) f32
    # TODO(synk): nn.Dropout(p=0.2) is identity in eval mode; not applied.
    o_ref[...] = (jnp.dot(pooled.astype(jnp.bfloat16), w_ref[...],
                          preferred_element_type=jnp.float32)
                  + b_ref[...]).astype(o_ref.dtype)


# ----------------------------------------------------------------------------
# Jitted Pallas wrappers (one Mosaic compile per distinct shape)
# ----------------------------------------------------------------------------
@jax.jit
def stem_linear_ln(x, w, b, g, beta):
    """Stem: (T, 48) @ (48, 128) + b, then LayerNorm epilogue."""
    T, K = x.shape
    N = w.shape[1]
    TB = min(512, _round_up(T, 8))
    Tp = _round_up(T, TB)
    xp = jnp.pad(x, ((0, Tp - T), (0, 0)))
    vmem = (2 * TB * K * 4 + 2 * K * N * 2 + 2 * TB * N * 4
            + 4 * TB * N * 4 + 8 * _MB)
    out = pl.pallas_call(
        _stem_kernel,
        out_shape=jax.ShapeDtypeStruct((Tp, N), jnp.float32),
        grid=(Tp // TB,),
        in_specs=[pl.BlockSpec((TB, K), lambda i: (i, 0)),
                  pl.BlockSpec((K, N), lambda i: (0, 0)),
                  pl.BlockSpec((1, N), lambda i: (0, 0)),
                  pl.BlockSpec((1, N), lambda i: (0, 0)),
                  pl.BlockSpec((1, N), lambda i: (0, 0))],
        out_specs=pl.BlockSpec((TB, N), lambda i: (i, 0)),
        compiler_params=pltpu.CompilerParams(
            dimension_semantics=("parallel",),
            vmem_limit_bytes=_vmem_limit(vmem)),
    )(xp, w, b, g, beta)
    return out[:T]


@jax.jit
def down_ln_linear(x, g, beta, w, b):
    """Downsample: per-position LayerNorm + 2x2/stride-2 conv as matmul."""
    T, K = x.shape                     # K = 4 * C_prev
    N = w.shape[1]
    TB = min(512, _round_up(T, 8))
    Tp = _round_up(T, TB)
    xp = jnp.pad(x, ((0, Tp - T), (0, 0)))
    vmem = (2 * TB * K * 4              # x tile double-buffered (f32)
            + 2 * K * N * 2             # weight double-buffered (bf16)
            + 2 * TB * N * 4            # out double-buffered (f32)
            + 3 * TB * K * 4            # LN / concat working values
            + 8 * _MB)
    out = pl.pallas_call(
        _down_kernel,
        out_shape=jax.ShapeDtypeStruct((Tp, N), jnp.float32),
        grid=(Tp // TB,),
        in_specs=[pl.BlockSpec((TB, K), lambda i: (i, 0)),
                  pl.BlockSpec((1, K // 4), lambda i: (0, 0)),
                  pl.BlockSpec((1, K // 4), lambda i: (0, 0)),
                  pl.BlockSpec((K, N), lambda i: (0, 0)),
                  pl.BlockSpec((1, N), lambda i: (0, 0))],
        out_specs=pl.BlockSpec((TB, N), lambda i: (i, 0)),
        compiler_params=pltpu.CompilerParams(
            dimension_semantics=("parallel",),
            vmem_limit_bytes=_vmem_limit(vmem)),
    )(xp, g, beta, w, b)
    return out[:T]


@jax.jit
def dwconv7(x_nhwc, k, b):
    """Depthwise 7x7, padding 3, groups=C.  Grid = (batch, channel tiles)."""
    N, H, W, C = x_nhwc.shape
    xp = jnp.pad(x_nhwc, ((0, 0), (3, 3), (3, 3), (0, 0)))
    CT = 128                                         # all DIMS are multiples
    vmem = (2 * (H + 6) * (W + 6) * CT * 4 + 2 * H * W * CT * 4
            + 4 * (H + 6) * (W + 6) * CT * 4 + 8 * _MB)
    return pl.pallas_call(
        _dwconv7_kernel,
        out_shape=jax.ShapeDtypeStruct((N, H, W, C), jnp.float32),
        grid=(N, C // CT),
        in_specs=[pl.BlockSpec((None, H + 6, W + 6, CT),
                               lambda n, c: (n, 0, 0, c)),
                  pl.BlockSpec((49, CT), lambda n, c: (0, c)),
                  pl.BlockSpec((1, CT), lambda n, c: (0, c))],
        out_specs=pl.BlockSpec((None, H, W, CT), lambda n, c: (n, 0, 0, c)),
        compiler_params=pltpu.CompilerParams(
            dimension_semantics=("parallel", "parallel"),
            vmem_limit_bytes=_vmem_limit(vmem)),
    )(xp, k, b)


@jax.jit
def cnblock_mlp(y, res, g, beta, w1, b1, w2, b2, ls):
    """Fused CNBlock tail.  Grid = (token tiles [parallel], hidden chunks [arbitrary]).

    For C <= 512 the hidden dim is NOT chunked (1 j-step) so the bf16 W1/W2
    have constant index_maps and stay VMEM-resident across all token tiles.
    For C = 1024 two chunks keep the per-step VMEM bounded (v7x 64 MiB safe).
    """
    T, C = y.shape
    H4 = w1.shape[1]
    TB = min(512 if C <= 512 else 256, _round_up(T, 8))
    Tp = _round_up(T, TB)
    HB = H4 if C <= 512 else H4 // 2
    yp = jnp.pad(y, ((0, Tp - T), (0, 0)))
    rp = jnp.pad(res, ((0, Tp - T), (0, 0)))
    vmem = (2 * 2 * C * HB * 2          # w1+w2 chunks, bf16, double-buffered
            + 2 * 2 * TB * C * 4        # y, res tiles, f32, double-buffered
            + 2 * TB * C * 4            # out tile, f32, double-buffered
            + TB * C * 2 + TB * C * 4   # t cache (bf16) + accumulator (f32)
            + 2 * TB * HB * 4           # hidden activation temporaries
            + 8 * _MB)                  # compiler scratch headroom
    out = pl.pallas_call(
        _cnblock_kernel,
        out_shape=jax.ShapeDtypeStruct((Tp, C), jnp.float32),
        grid=(Tp // TB, H4 // HB),
        in_specs=[
            pl.BlockSpec((TB, C), lambda i, j: (i, 0)),    # y (post-dwconv)
            pl.BlockSpec((TB, C), lambda i, j: (i, 0)),    # residual input
            pl.BlockSpec((1, C), lambda i, j: (0, 0)),     # LN gamma
            pl.BlockSpec((1, C), lambda i, j: (0, 0)),     # LN beta
            pl.BlockSpec((C, HB), lambda i, j: (0, j)),    # w1 chunk (bf16)
            pl.BlockSpec((1, HB), lambda i, j: (0, j)),    # b1 chunk
            pl.BlockSpec((HB, C), lambda i, j: (j, 0)),    # w2 chunk (bf16)
            pl.BlockSpec((1, C), lambda i, j: (0, 0)),     # b2
            pl.BlockSpec((1, C), lambda i, j: (0, 0)),     # layer scale
        ],
        out_specs=pl.BlockSpec((TB, C), lambda i, j: (i, 0)),
        scratch_shapes=[pltpu.VMEM((TB, C), jnp.bfloat16),   # cached LN'd tile
                        pltpu.VMEM((TB, C), jnp.float32)],   # accumulator
        compiler_params=pltpu.CompilerParams(
            dimension_semantics=("parallel", "arbitrary"),
            vmem_limit_bytes=_vmem_limit(vmem)),
    )(yp, rp, g, beta, w1, b1, w2, b2, ls)
    return out[:T]


@jax.jit
def head(x_nsc, w, b):
    """AvgPool + Linear head, batch-tiled grid (does not load whole act)."""
    N, S, C = x_nsc.shape
    nc = w.shape[1]
    NB = min(N, 8)
    Np = _round_up(N, NB)
    xp = jnp.pad(x_nsc, ((0, Np - N), (0, 0), (0, 0)))
    out = pl.pallas_call(
        _head_kernel,
        out_shape=jax.ShapeDtypeStruct((Np, nc), jnp.float32),
        grid=(Np // NB,),
        in_specs=[pl.BlockSpec((NB, S, C), lambda i: (i, 0, 0)),
                  pl.BlockSpec((C, nc), lambda i: (0, 0)),
                  pl.BlockSpec((1, nc), lambda i: (0, 0))],
        out_specs=pl.BlockSpec((NB, nc), lambda i: (i, 0)),
        compiler_params=pltpu.CompilerParams(
            dimension_semantics=("parallel",)),
    )(xp, w, b)
    return out[:N]


# ----------------------------------------------------------------------------
# Model assembly (wrapper-side layout plumbing only)
# ----------------------------------------------------------------------------
def _patchify(x_nhwc, p):
    """Non-overlapping p x p patches, flattened (ph, pw, c) -> lane axis."""
    # TODO(synk): this relayout could be folded into the consumer matmul's
    # BlockSpec to save one activation round trip per stage transition.
    N, H, W, C = x_nhwc.shape
    x = x_nhwc.reshape(N, H // p, p, W // p, p, C)
    x = jnp.transpose(x, (0, 1, 3, 2, 4, 5))
    return x.reshape(N * (H // p) * (W // p), p * p * C)


def convnext_forward(x, params):
    """x: (N, 3, H, W) float32  ->  (N, n_classes) logits."""
    N, _, H, W = x.shape
    t = jnp.transpose(x, (0, 2, 3, 1))                       # NHWC

    # Stem: 4x4 / stride-4 conv (as patchify matmul) fused with LayerNorm2d.
    t = stem_linear_ln(_patchify(t, 4), params["stem_w"], params["stem_b"],
                       params["stem_g"], params["stem_beta"])
    h, w = H // 4, W // 4

    for stage in params["stages"]:
        if stage["down"] is not None:
            d = stage["down"]
            t = down_ln_linear(_patchify(t.reshape(N, h, w, -1), 2),
                               d["g"], d["b"], d["w"], d["wb"])
            h, w = h // 2, w // 2
        for blk in stage["blocks"]:
            C = t.shape[-1]
            y = dwconv7(t.reshape(N, h, w, C), blk["dw_k"], blk["dw_b"])
            t = cnblock_mlp(y.reshape(N * h * w, C), t,
                            blk["ln_g"], blk["ln_b"], blk["w1"], blk["b1"],
                            blk["w2"], blk["b2"], blk["ls"])

    C = t.shape[-1]
    return head(t.reshape(N, h * w, C), params["head_w"], params["head_b"])


# ----------------------------------------------------------------------------
# Parameters (matmul weights stored bf16; LN/bias/scale/dwconv stay f32)
# ----------------------------------------------------------------------------
def init_params(key, n_classes):
    # TODO(synk): pretrained=True weights cannot be fetched (no network);
    # ConvNeXt init (trunc_normal std=0.02 ~ normal here, zero bias, LN=1/0,
    # layer_scale=1e-6) is used instead.
    keys = iter(jax.random.split(key, 512))

    def nrm(shape, dtype=jnp.float32):
        return (0.02 * jax.random.normal(next(keys), shape, jnp.float32)
                ).astype(dtype)

    bf16 = jnp.bfloat16
    params = {
        "stem_w": nrm((4 * 4 * 3, DIMS[0]), bf16),
        "stem_b": jnp.zeros((1, DIMS[0]), jnp.float32),
        "stem_g": jnp.ones((1, DIMS[0]), jnp.float32),
        "stem_beta": jnp.zeros((1, DIMS[0]), jnp.float32),
        "stages": [],
    }
    for si, (depth, dim) in enumerate(zip(DEPTHS, DIMS)):
        stage = {"down": None, "blocks": []}
        if si > 0:
            prev = DIMS[si - 1]
            stage["down"] = {
                "g": jnp.ones((1, prev), jnp.float32),
                "b": jnp.zeros((1, prev), jnp.float32),
                "w": nrm((2 * 2 * prev, dim), bf16),
                "wb": jnp.zeros((1, dim), jnp.float32),
            }
        for _ in range(depth):
            stage["blocks"].append({
                "dw_k": nrm((49, dim)),
                "dw_b": jnp.zeros((1, dim), jnp.float32),
                "ln_g": jnp.ones((1, dim), jnp.float32),
                "ln_b": jnp.zeros((1, dim), jnp.float32),
                "w1": nrm((dim, 4 * dim), bf16),
                "b1": jnp.zeros((1, 4 * dim), jnp.float32),
                "w2": nrm((4 * dim, dim), bf16),
                "b2": jnp.zeros((1, dim), jnp.float32),
                "ls": jnp.full((1, dim), LAYER_SCALE_INIT, jnp.float32),
            })
        params["stages"].append(stage)

    bound = 1.0 / (DIMS[-1] ** 0.5)
    kw, kb = jax.random.split(next(keys))
    params["head_w"] = jax.random.uniform(kw, (DIMS[-1], n_classes),
                                          jnp.float32, -bound, bound).astype(bf16)
    params["head_b"] = jax.random.uniform(kb, (1, n_classes),
                                          jnp.float32, -bound, bound)
    return params


# ----------------------------------------------------------------------------
# Pure-JAX reference (f32 math; bf16-stored weights upcast) for the check
# ----------------------------------------------------------------------------
def _f32(a):
    return a.astype(jnp.float32)


def _ref_patch_conv(x, w, b, p):
    cin, cout = x.shape[-1], w.shape[-1]
    wr = _f32(w).reshape(p, p, cin, cout)
    y = lax.conv_general_dilated(x, wr, (p, p), "VALID",
                                 dimension_numbers=("NHWC", "HWIO", "NHWC"))
    return y + b


def _ref_dwconv(x, k, b):
    c = x.shape[-1]
    wr = k.reshape(7, 7, 1, c)
    y = lax.conv_general_dilated(x, wr, (1, 1), ((3, 3), (3, 3)),
                                 dimension_numbers=("NHWC", "HWIO", "NHWC"),
                                 feature_group_count=c)
    return y + b


def _ref_ln(x, g, b):
    m = jnp.mean(x, -1, keepdims=True)
    v = jnp.mean((x - m) ** 2, -1, keepdims=True)
    return (x - m) * jax.lax.rsqrt(v + LN_EPS) * g + b


def reference_forward(x, params):
    t = jnp.transpose(x, (0, 2, 3, 1))
    t = _ref_patch_conv(t, params["stem_w"], params["stem_b"], 4)
    t = _ref_ln(t, params["stem_g"], params["stem_beta"])
    for stage in params["stages"]:
        if stage["down"] is not None:
            d = stage["down"]
            t = _ref_ln(t, d["g"], d["b"])
            t = _ref_patch_conv(t, d["w"], d["wb"], 2)
        for blk in stage["blocks"]:
            y = _ref_dwconv(t, blk["dw_k"], blk["dw_b"])
            y = _ref_ln(y, blk["ln_g"], blk["ln_b"])
            y = _gelu(y @ _f32(blk["w1"]) + blk["b1"]) @ _f32(blk["w2"]) + blk["b2"]
            t = t + blk["ls"] * y
    pooled = jnp.mean(t, axis=(1, 2))
    return pooled @ _f32(params["head_w"]) + params["head_b"]


# ----------------------------------------------------------------------------
if __name__ == "__main__":
    key = jax.random.PRNGKey(0)
    kx, kp = jax.random.split(key)

    n_classes = 10
    x = jax.random.normal(kx, (2, 3, 64, 64), jnp.float32)
    params = init_params(kp, n_classes)

    out = convnext_forward(x, params)
    out = jax.block_until_ready(out)
    assert out.shape == (2, n_classes), out.shape
    assert bool(jnp.all(jnp.isfinite(out))), "non-finite output"

    with jax.default_matmul_precision("highest"):
        ref = reference_forward(x, params)
    ref = jax.block_until_ready(ref)
    err = float(jnp.max(jnp.abs(out - ref)))
    assert err < 3e-2, err

    print("KERNEL_OK")
</pallas_src>

<mosaic_0001>
module attributes {stable_mosaic.version = 11 : i64} {
  func.func @_stem_kernel(%arg0: i32, %arg1: memref<512x48xf32, #tpu.memory_space<vmem>>, %arg2: memref<48x128xbf16, #tpu.memory_space<vmem>>, %arg3: memref<1x128xf32, #tpu.memory_space<vmem>>, %arg4: memref<1x128xf32, #tpu.memory_space<vmem>>, %arg5: memref<1x128xf32, #tpu.memory_space<vmem>>, %arg6: memref<512x128xf32, #tpu.memory_space<vmem>>) attributes {dimension_semantics = [#tpu.dimension_semantics<parallel>], iteration_bounds = array<i64: 1>, scalar_prefetch = 0 : i64, scratch_operands = 0 : i64, tpu.core_type = #tpu.core_type<tc>, window_params = [{transform_indices = @transform_0, window_bounds = array<i64: 512, 48>}, {pipeline_mode = #tpu.pipeline_mode<synchronous>, transform_indices = @transform_1, window_bounds = array<i64: 48, 128>}, {pipeline_mode = #tpu.pipeline_mode<synchronous>, transform_indices = @transform_2, window_bounds = array<i64: 1, 128>}, {pipeline_mode = #tpu.pipeline_mode<synchronous>, transform_indices = @transform_3, window_bounds = array<i64: 1, 128>}, {pipeline_mode = #tpu.pipeline_mode<synchronous>, transform_indices = @transform_4, window_bounds = array<i64: 1, 128>}, {transform_indices = @transform_5, window_bounds = array<i64: 512, 128>}]} {
    %c0 = arith.constant 0 : index
    %c0_0 = arith.constant 0 : index
    %0 = vector.load %arg1[%c0, %c0_0] : memref<512x48xf32, #tpu.memory_space<vmem>>, vector<512x48xf32>
    %1 = arith.truncf %0 : vector<512x48xf32> to vector<512x48xbf16>
    %c0_1 = arith.constant 0 : index
    %c0_2 = arith.constant 0 : index
    %2 = vector.load %arg2[%c0_1, %c0_2] : memref<48x128xbf16, #tpu.memory_space<vmem>>, vector<48x128xbf16>
    %cst = arith.constant dense<0.000000e+00> : vector<512x128xf32>
    %3 = tpu.matmul %1, %2, %cst {dimension_numbers = #tpu.dot_dimension_numbers<[1], [0], [0], [1], [0, 0, 1, 1], [], []>} : vector<512x48xbf16>, vector<48x128xbf16>, vector<512x128xf32> -> vector<512x128xf32>
    %c0_3 = arith.constant 0 : index
    %c0_4 = arith.constant 0 : index
    %4 = vector.load %arg3[%c0_3, %c0_4] : memref<1x128xf32, #tpu.memory_space<vmem>>, vector<1x128xf32>
    %5 = vector.broadcast %4 : vector<1x128xf32> to vector<512x128xf32>
    %6 = arith.addf %3, %5 : vector<512x128xf32>
    %cst_5 = arith.constant dense<0.000000e+00> : vector<512xf32>
    %7 = vector.multi_reduction <add>, %6, %cst_5 [1] : vector<512x128xf32> to vector<512xf32>
    %8 = vector.shape_cast %7 : vector<512xf32> to vector<512x1xf32>
    %cst_6 = arith.constant 1.280000e+02 : f32
    %9 = vector.broadcast %cst_6 : f32 to vector<512x1xf32>
    %10 = arith.divf %8, %9 : vector<512x1xf32>
    %11 = vector.broadcast %10 : vector<512x1xf32> to vector<512x128xf32>
    %12 = arith.subf %6, %11 : vector<512x128xf32>
    %13 = arith.mulf %12, %12 : vector<512x128xf32>
    %cst_7 = arith.constant dense<0.000000e+00> : vector<512xf32>
    %14 = vector.multi_reduction <add>, %13, %cst_7 [1] : vector<512x128xf32> to vector<512xf32>
    %15 = vector.shape_cast %14 : vector<512xf32> to vector<512x1xf32>
    %cst_8 = arith.constant 1.280000e+02 : f32
    %16 = vector.broadcast %cst_8 : f32 to vector<512x1xf32>
    %17 = arith.divf %15, %16 : vector<512x1xf32>
    %18 = vector.broadcast %10 : vector<512x1xf32> to vector<512x128xf32>
    %19 = arith.subf %6, %18 : vector<512x128xf32>
    %cst_9 = arith.constant 9.99999997E-7 : f32
    %20 = vector.broadcast %cst_9 : f32 to vector<512x1xf32>
    %21 = arith.addf %17, %20 : vector<512x1xf32>
    %22 = math.rsqrt %21 : vector<512x1xf32>
    %23 = vector.broadcast %22 : vector<512x1xf32> to vector<512x128xf32>
    %24 = arith.mulf %19, %23 : vector<512x128xf32>
    %c0_10 = arith.constant 0 : index
    %c0_11 = arith.constant 0 : index
    %25 = vector.load %arg4[%c0_10, %c0_11] : memref<1x128xf32, #tpu.memory_space<vmem>>, vector<1x128xf32>
    %26 = vector.broadcast %25 : vector<1x128xf32> to vector<512x128xf32>
    %27 = arith.mulf %24, %26 : vector<512x128xf32>
    %c0_12 = arith.constant 0 : index
    %c0_13 = arith.constant 0 : index
    %28 = vector.load %arg5[%c0_12, %c0_13] : memref<1x128xf32, #tpu.memory_space<vmem>>, vector<1x128xf32>
    %29 = vector.broadcast %28 : vector<1x128xf32> to vector<512x128xf32>
    %30 = arith.addf %27, %29 : vector<512x128xf32>
    %c0_14 = arith.constant 0 : index
    %c0_15 = arith.constant 0 : index
    %31 = vector.load %arg6[%c0_14, %c0_15] : memref<512x128xf32, #tpu.memory_space<vmem>>, vector<512x128xf32>
    tpu.vector_store %arg6[%c0_14, %c0_15], %30 {strides = array<i32>} : memref<512x128xf32, #tpu.memory_space<vmem>>, vector<512x128xf32>,
    return
  }
  func.func @transform_0(%arg0: i32) -> (i32, i32) {
    %c0_i32 = arith.constant 0 : i32
    %c0_i32_0 = arith.constant 0 : i32
    return %arg0, %c0_i32 : i32, i32
  }
  func.func @transform_1(%arg0: i32) -> (i32, i32) {
    %c0_i32 = arith.constant 0 : i32
    %c0_i32_0 = arith.constant 0 : i32
    %c0_i32_1 = arith.constant 0 : i32
    return %c0_i32, %c0_i32_0 : i32, i32
  }
  func.func @transform_2(%arg0: i32) -> (i32, i32) {
    %c0_i32 = arith.constant 0 : i32
    %c0_i32_0 = arith.constant 0 : i32
    %c0_i32_1 = arith.constant 0 : i32
    return %c0_i32, %c0_i32_0 : i32, i32
  }
  func.func @transform_3(%arg0: i32) -> (i32, i32) {
    %c0_i32 = arith.constant 0 : i32
    %c0_i32_0 = arith.constant 0 : i32
    %c0_i32_1 = arith.constant 0 : i32
    return %c0_i32, %c0_i32_0 : i32, i32
  }
  func.func @transform_4(%arg0: i32) -> (i32, i32) {
    %c0_i32 = arith.constant 0 : i32
    %c0_i32_0 = arith.constant 0 : i32
    %c0_i32_1 = arith.constant 0 : i32
    return %c0_i32, %c0_i32_0 : i32, i32
  }
  func.func @transform_5(%arg0: i32) -> (i32, i32) {
    %c0_i32 = arith.constant 0 : i32
    %c0_i32_0 = arith.constant 0 : i32
    return %arg0, %c0_i32 : i32, i32
  }
}

</mosaic_0001>

<bundles_post_ra>
// kernel: stem_linear_ln.1
= control target key start
LH: loop header
LB: loop body
LE: loop exit
PB: predicated region body
PF: predicated region fallthrough
CT: control target
= control target key end

     0   :  { %vm149_vm0 = vcmask 392192   ;;  %s2814_s0 = inlined_call_operand.vmem [shape: f32[512,48], index: 0, kind: input, shape index: {}]   ;;  %s2815_s1 = inlined_call_operand.vmem [shape: bf16[48,128], index: 1, kind: input, shape index: {}]   ;;  %s2816_s2 = inlined_call_operand.vmem [shape: f32[1,128], index: 2, kind: input, shape index: {}]   ;;  %s2817_s3 = inlined_call_operand.vmem [shape: f32[1,128], index: 3, kind: input, shape index: {}]   ;;  %s2818_s4 = inlined_call_operand.vmem [shape: f32[1,128], index: 4, kind: input, shape index: {}]   ;;  %s2819_s5 = inlined_call_operand.hbm [shape: f32[512,128], index: 5, kind: output, shape index: {}]  }
   0x1   :  { %v1614_v0 = vld [vmem:[%s2815_s1 + $0x10] sm:$0xff]   ;;  %v1615_v1 = vld [vmem:[%s2815_s1 + $0x8] sm:$0xff]   ;;  %v22_v2 = vld [vmem:[%s2814_s0] sm:$0xff] }
   0x2   :  { %1535 = vmatprep.subr.bf16.mxu0 %v1614_v0  ;;  %1605 = vmatprep.subr.bf16.mxu1 %v1614_v0  ;;  %v23_v3 = vld [vmem:[%s2814_s0 + $0x8] sm:$0xff]  ;;  %v54_v4 = vld [vmem:[%s2814_s0 + $0x100] sm:$0xff]  ;;  %v24_v9 = vld [vmem:[%s2814_s0 + $0x10] sm:$0xff] }
   0x3   :  { %1536 = vmatpush3.bf16.msra.mxu0 %v1614_v0  ;;  %1608 = vmatpush3.bf16.msra.mxu1 %v1614_v0  ;;  %v1616_v5 = vld [vmem:[%s2815_s1] sm:$0xff]   ;;  %v86_v6 = vpack.c.bf16 %v23_v3, %v22_v2  ;;  %v55_v7 = vld [vmem:[%s2814_s0 + $0x108] sm:$0xff]  ;;  %v25_v10 = vld [vmem:[%s2814_s0 + $0x18] sm:$0xff] }
   0x4   :  { %1537 = vmatprep.subr.bf16.mxu0 %v1615_v1  ;;  %1606 = vmatprep.subr.bf16.mxu1 %v1615_v1  ;;  %v102_v8 = vpack.c.bf16 %v55_v7, %v54_v4  ;;  %v56_v11 = vld [vmem:[%s2814_s0 + $0x110] sm:$0xff]  ;;  %v57_v12 = vld [vmem:[%s2814_s0 + $0x118] sm:$0xff]  ;;  %v26_v13 = vld [vmem:[%s2814_s0 + $0x20] sm:$0xff]  ;;  %v87_v17 = vpack.c.bf16 %v25_v10, %v24_v9 }
   0x5   :  { %1541 = vmatprep.mubr.msk.bf16.mxu0 %vm149_vm0, %v86_v6  ;;  %v27_v14 = vld [vmem:[%s2814_s0 + $0x28] sm:$0xff]  ;;  %v58_v15 = vld [vmem:[%s2814_s0 + $0x120] sm:$0xff]  ;;  %v103_v18 = vpack.c.bf16 %v57_v12, %v56_v11  ;;  %v28_v21 = vld [vmem:[%s2814_s0 + $0x30] sm:$0xff] }
   0x6   :  { %v59_v16 = vld [vmem:[%s2814_s0 + $0x128] sm:$0xff]  ;;  %1573 = vmatprep.mubr.msk.bf16.mxu1 %vm149_vm0, %v102_v8  ;;  %v88_v19 = vpack.c.bf16 %v27_v14, %v26_v13  ;;  %v29_v22 = vld [vmem:[%s2814_s0 + $0x38] sm:$0xff]  ;;  %v60_v23 = vld [vmem:[%s2814_s0 + $0x130] sm:$0xff] }
   0x7   :  { %1538 = vmatpush3.bf16.msra.mxu0 %v1615_v1  ;;  %1609 = vmatpush3.bf16.msra.mxu1 %v1615_v1  ;;  %v104_v20 = vpack.c.bf16 %v59_v16, %v58_v15  ;;  %v61_v24 = vld [vmem:[%s2814_s0 + $0x138] sm:$0xff]  ;;  %v30_v25 = vld [vmem:[%s2814_s0 + $0x40] sm:$0xff]  ;;  %v31_v26 = vld [vmem:[%s2814_s0 + $0x48] sm:$0xff]  ;;  %v89_v29 = vpack.c.bf16 %v29_v22, %v28_v21 }
   0x8   :  { %1539 = vmatprep.subr.bf16.mxu0 %v1616_v5  ;;  %1607 = vmatprep.subr.bf16.mxu1 %v1616_v5  ;;  %v62_v27 = vld [vmem:[%s2814_s0 + $0x140] sm:$0xff]  ;;  %v63_v28 = vld [vmem:[%s2814_s0 + $0x148] sm:$0xff]  ;;  %v105_v30 = vpack.c.bf16 %v61_v24, %v60_v23  ;;  %v90_v31 = vpack.c.bf16 %v31_v26, %v30_v25  ;;  %v32_v33 = vld [vmem:[%s2814_s0 + $0x50] sm:$0xff] }
   0x9   :  { %v106_v32 = vpack.c.bf16 %v63_v28, %v62_v27  ;;  %v33_v34 = vld [vmem:[%s2814_s0 + $0x58] sm:$0xff]  ;;  %v64_v35 = vld [vmem:[%s2814_s0 + $0x150] sm:$0xff]  ;;  %v34_v37 = vld [vmem:[%s2814_s0 + $0x60] sm:$0xff] }
   0xa   :  { %v65_v36 = vld [vmem:[%s2814_s0 + $0x158] sm:$0xff]  ;;  %v35_v38 = vld [vmem:[%s2814_s0 + $0x68] sm:$0xff]  ;;  %v66_v39 = vld [vmem:[%s2814_s0 + $0x160] sm:$0xff] }
   0xb   :  { %1540 = vmatpush3.bf16.msra.mxu0 %v1616_v5  ;;  %1610 = vmatpush3.bf16.msra.mxu1 %v1616_v5  ;;  %v67_v40 = vld [vmem:[%s2814_s0 + $0x168] sm:$0xff] }
   0xe   :  { %1542 = vmatmul.mubr.msk.bf16.vlgmr.msra.gmra.mxu0 %vm149_vm0, %v87_v17  ;;  %1574 = vmatmul.mubr.msk.bf16.vlgmr.msra.gmra.mxu1 %vm149_vm0, %v103_v18 }
   0xf   :  { %1545 = vmatprep.mubr.msk.bf16.mxu0 %vm149_vm0, %v88_v19  ;;  %1577 = vmatprep.mubr.msk.bf16.mxu1 %vm149_vm0, %v104_v20 }
  0x16   :  { %1546 = vmatmul.mubr.msk.bf16.gmra.mxu0 %vm149_vm0, %v89_v29  ;;  %1578 = vmatmul.mubr.msk.bf16.gmra.mxu1 %vm149_vm0, %v105_v30 }
  0x17   :  { %1549 = vmatprep.mubr.msk.bf16.mxu0 %vm149_vm0, %v90_v31  ;;  %1581 = vmatprep.mubr.msk.bf16.mxu1 %vm149_vm0, %v106_v32 }
  0x18   :  { %10 = vsyncpa [#allocation3], 0  ;;  %v91_v41 = vpack.c.bf16 %v33_v34, %v32_v33  ;;  %v107_v42 = vpack.c.bf16 %v65_v36, %v64_v35  ;;  %v92_v43 = vpack.c.bf16 %v35_v38, %v34_v37  ;;  %v108_v44 = vpack.c.bf16 %v67_v40, %v66_v39  ;;  %v36_v45 = vld [vmem:[%s2814_s0 + $0x70] sm:$0xff]  ;;  %v37_v46 = vld [vmem:[%s2814_s0 + $0x78] sm:$0xff] }
  0x19   :  { %v68_v47 = vld [vmem:[%s2814_s0 + $0x170] sm:$0xff]  ;;  %v69_v48 = vld [vmem:[%s2814_s0 + $0x178] sm:$0xff]  ;;  %v38_v49 = vld [vmem:[%s2814_s0 + $0x80] sm:$0xff]  ;;  %v93_v53 = vpack.c.bf16 %v37_v46, %v36_v45 }
  0x1a   :  { %v39_v50 = vld [vmem:[%s2814_s0 + $0x88] sm:$0xff]  ;;  %v70_v51 = vld [vmem:[%s2814_s0 + $0x180] sm:$0xff]  ;;  %v109_v54 = vpack.c.bf16 %v69_v48, %v68_v47  ;;  %v40_v57 = vld [vmem:[%s2814_s0 + $0x90] sm:$0xff] }
  0x1b   :  { %v71_v52 = vld [vmem:[%s2814_s0 + $0x188] sm:$0xff]  ;;  %v94_v55 = vpack.c.bf16 %v39_v50, %v38_v49  ;;  %v41_v58 = vld [vmem:[%s2814_s0 + $0x98] sm:$0xff]  ;;  %v72_v59 = vld [vmem:[%s2814_s0 + $0x190] sm:$0xff] }
  0x1c   :  { %v110_v56 = vpack.c.bf16 %v71_v52, %v70_v51  ;;  %v73_v60 = vld [vmem:[%s2814_s0 + $0x198] sm:$0xff]  ;;  %v42_v61 = vld [vmem:[%s2814_s0 + $0xa0] sm:$0xff]  ;;  %v43_v62 = vld [vmem:[%s2814_s0 + $0xa8] sm:$0xff]  ;;  %v95_v1 = vpack.c.bf16 %v41_v58, %v40_v57 }
  0x1d   :  { %v74_v63 = vld [vmem:[%s2814_s0 + $0x1a0] sm:$0xff]  ;;  %v75_v0 = vld [vmem:[%s2814_s0 + $0x1a8] sm:$0xff]  ;;  %v111_v2 = vpack.c.bf16 %v73_v60, %v72_v59  ;;  %v96_v3 = vpack.c.bf16 %v43_v62, %v42_v61  ;;  %v44_v5 = vld [vmem:[%s2814_s0 + $0xb0] sm:$0xff] }
  0x1e   :  { %1550 = vmatmul.mubr.msk.bf16.gmra.mxu0 %vm149_vm0, %v91_v41  ;;  %1582 = vmatmul.mubr.msk.bf16.gmra.mxu1 %vm149_vm0, %v107_v42  ;;  %v112_v4 = vpack.c.bf16 %v75_v0, %v74_v63  ;;  %v45_v6 = vld [vmem:[%s2814_s0 + $0xb8] sm:$0xff]  ;;  %v76_v7 = vld [vmem:[%s2814_s0 + $0x1b0] sm:$0xff]  ;;  %v46_v9 = vld [vmem:[%s2814_s0 + $0xc0] sm:$0xff] }
  0x1f   :  { %1553 = vmatprep.mubr.msk.bf16.mxu0 %vm149_vm0, %v92_v43  ;;  %1585 = vmatprep.mubr.msk.bf16.mxu1 %vm149_vm0, %v108_v44  ;;  %v77_v8 = vld [vmem:[%s2814_s0 + $0x1b8] sm:$0xff]  ;;  %v47_v10 = vld [vmem:[%s2814_s0 + $0xc8] sm:$0xff]  ;;  %v78_v11 = vld [vmem:[%s2814_s0 + $0x1c0] sm:$0xff]  ;;  %v97_v13 = vpack.c.bf16 %v45_v6, %v44_v5 }
  0x20   :  { %v79_v12 = vld [vmem:[%s2814_s0 + $0x1c8] sm:$0xff]  ;;  %v113_v14 = vpack.c.bf16 %v77_v8, %v76_v7  ;;  %v98_v15 = vpack.c.bf16 %v47_v10, %v46_v9  ;;  %v48_v17 = vld [vmem:[%s2814_s0 + $0xd0] sm:$0xff]  ;;  %v49_v18 = vld [vmem:[%s2814_s0 + $0xd8] sm:$0xff] }
  0x21   :  { %v114_v16 = vpack.c.bf16 %v79_v12, %v78_v11  ;;  %v80_v19 = vld [vmem:[%s2814_s0 + $0x1d0] sm:$0xff]  ;;  %v81_v20 = vld [vmem:[%s2814_s0 + $0x1d8] sm:$0xff]  ;;  %v50_v21 = vld [vmem:[%s2814_s0 + $0xe0] sm:$0xff]  ;;  %v99_v25 = vpack.c.bf16 %v49_v18, %v48_v17 }
  0x22   :  { %v51_v22 = vld [vmem:[%s2814_s0 + $0xe8] sm:$0xff]  ;;  %v82_v23 = vld [vmem:[%s2814_s0 + $0x1e0] sm:$0xff]  ;;  %v115_v26 = vpack.c.bf16 %v81_v20, %v80_v19  ;;  %v52_v29 = vld [vmem:[%s2814_s0 + $0xf0] sm:$0xff] }
  0x23   :  { %v83_v24 = vld [vmem:[%s2814_s0 + $0x1e8] sm:$0xff]  ;;  %v100_v27 = vpack.c.bf16 %v51_v22, %v50_v21  ;;  %v53_v30 = vld [vmem:[%s2814_s0 + $0xf8] sm:$0xff]  ;;  %v84_v31 = vld [vmem:[%s2814_s0 + $0x1f0] sm:$0xff] }
  0x24   :  { %v116_v28 = vpack.c.bf16 %v83_v24, %v82_v23  ;;  %v85_v32 = vld [vmem:[%s2814_s0 + $0x1f8] sm:$0xff]  ;;  %v101_v33 = vpack.c.bf16 %v53_v30, %v52_v29  ;;  %v2038_v35 = vld [vmem:[%s2816_s2] ss:$0 sm:$0xff] }
  0x25   :  { %v117_v34 = vpack.c.bf16 %v85_v32, %v84_v31 }
  0x26   :  { %1554 = vmatmul.mubr.msk.bf16.gmra.mxu0 %vm149_vm0, %v93_v53  ;;  %1586 = vmatmul.mubr.msk.bf16.gmra.mxu1 %vm149_vm0, %v109_v54 }
  0x27   :  { %1557 = vmatprep.mubr.msk.bf16.mxu0 %vm149_vm0, %v94_v55  ;;  %1589 = vmatprep.mubr.msk.bf16.mxu1 %vm149_vm0, %v110_v56 }
  0x2e   :  { %1558 = vmatmul.mubr.msk.bf16.gmra.mxu0 %vm149_vm0, %v95_v1  ;;  %1590 = vmatmul.mubr.msk.bf16.gmra.mxu1 %vm149_vm0, %v111_v2 }
  0x2f   :  { %1561 = vmatprep.mubr.msk.bf16.mxu0 %vm149_vm0, %v96_v3  ;;  %1593 = vmatprep.mubr.msk.bf16.mxu1 %vm149_vm0, %v112_v4 }
  0x36   :  { %1562 = vmatmul.mubr.msk.bf16.gmra.mxu0 %vm149_vm0, %v97_v13  ;;  %1594 = vmatmul.mubr.msk.bf16.gmra.mxu1 %vm149_vm0, %v113_v14 }
  0x37   :  { %1565 = vmatprep.mubr.msk.bf16.mxu0 %vm149_vm0, %v98_v15  ;;  %1597 = vmatprep.mubr.msk.bf16.mxu1 %vm149_vm0, %v114_v16 }
  0x3e   :  { %1566 = vmatmul.mubr.msk.bf16.gmra.mxu0 %vm149_vm0, %v99_v25  ;;  %1598 = vmatmul.mubr.msk.bf16.gmra.mxu1 %vm149_vm0, %v115_v26 }
  0x3f   :  { %1569 = vmatprep.mubr.msk.bf16.mxu0 %vm149_vm0, %v100_v27  ;;  %1601 = vmatprep.mubr.msk.bf16.mxu1 %vm149_vm0, %v116_v28 }
  0x46   :  { %1570 = vmatmul.mubr.msk.bf16.gmra.mxu0 %vm149_vm0, %v101_v33  ;;  %1602 = vmatmul.mubr.msk.bf16.gmra.mxu1 %vm149_vm0, %v117_v34 }
  0xce   :  { %v1543_v36 = vpop.f32.mrf.mxu0  ;;  %v1575_v37 = vpop.f32.mrf.mxu1 }
  0xcf   :  { %v2041_v38 = vadd.f32 %v1543_v36, %v2038_v35  ;;  %v2044_v39 = vadd.f32 %v1575_v37, %v2038_v35 }
  0xd0   :  { %v280_v40 = vpop.f32.mrf.mxu0  ;;  %v408_v41 = vpop.f32.mrf.mxu1 }
  0xd1   :  { %603 = vadd.xlane.f32.xlu0 %v2044_v39  ;;  %539 = vadd.xlane.f32.xlu1 %v2041_v38  ;;  %v2049_v43 = vadd.f32 %v2038_v35, %v280_v40  ;;  %v2057_v48 = vadd.f32 %v2038_v35, %v408_v41 }
  0xd2   :  { %v1544_v42 = vpop.f32.mrf.mxu0  ;;  %v1576_v45 = vpop.f32.mrf.mxu1 }
  0xd3   :  { %v2052_v44 = vadd.f32 %v1544_v42, %v2038_v35  ;;  %v2060_v49 = vadd.f32 %v1576_v45, %v2038_v35 }
  0xd4   :  { %v283_v46 = vpop.f32.mrf.mxu0  ;;  %v411_v50 = vpop.f32.mrf.mxu1 }
  0xd5   :  { %541 = vadd.xlane.f32.xlu1 %v2052_v44  ;;  %535 = vadd.xlane.f32.xlu0 %v2049_v43  ;;  %v2065_v53 = vadd.f32 %v2038_v35, %v283_v46  ;;  %v2068_v54 = vadd.f32 %v2038_v35, %v411_v50 }
  0xd6   :  { %v1547_v47 = vpop.f32.mrf.mxu0  ;;  %v1579_v52 = vpop.f32.mrf.mxu1 }
  0xd7   :  { %v2073_v57 = vadd.f32 %v1547_v47, %v2038_v35  ;;  %v2081_v60 = vadd.f32 %v1579_v52, %v2038_v35 }
  0xd8   :  { %v296_v51 = vpop.f32.mrf.mxu0  ;;  %v424_v56 = vpop.f32.mrf.mxu1 }
  0xd9   :  { %605 = vadd.xlane.f32.xlu1 %v2060_v49  ;;  %599 = vadd.xlane.f32.xlu0 %v2057_v48  ;;  %v2089_v0 = vadd.f32 %v2038_v35, %v296_v51  ;;  %v2097_v5 = vadd.f32 %v2038_v35, %v424_v56 }
  0xda   :  { %v1548_v55 = vpop.f32.mrf.mxu0  ;;  %v1580_v59 = vpop.f32.mrf.mxu1 }
  0xdb   :  { %v2076_v58 = vadd.f32 %v1548_v55, %v2038_v35  ;;  %v2084_v61 = vadd.f32 %v1580_v59, %v2038_v35 }
  0xdc   :  { %v299_v62 = vpop.f32.mrf.mxu0  ;;  %v427_v2 = vpop.f32.mrf.mxu1 }
  0xdd   :  { %601 = vadd.xlane.f32.xlu1 %v2068_v54  ;;  %537 = vadd.xlane.f32.xlu0 %v2065_v53  ;;  %v2092_v1 = vadd.f32 %v2038_v35, %v299_v62  ;;  %v2100_v6 = vadd.f32 %v2038_v35, %v427_v2 }
  0xde   :  { %v1551_v63 = vpop.f32.mrf.mxu0  ;;  %v1583_v4 = vpop.f32.mrf.mxu1 }
  0xdf   :  { %v2105_v9 = vadd.f32 %v1551_v63, %v2038_v35  ;;  %v2113_v12 = vadd.f32 %v1583_v4, %v2038_v35 }
  0xe0   :  { %v312_v3 = vpop.f32.mrf.mxu0  ;;  %v440_v8 = vpop.f32.mrf.mxu1 }
  0xe1   :  { %549 = vadd.xlane.f32.xlu1 %v2076_v58  ;;  %547 = vadd.xlane.f32.xlu0 %v2073_v57  ;;  %v2121_v16 = vadd.f32 %v2038_v35, %v312_v3  ;;  %v2129_v21 = vadd.f32 %v2038_v35, %v440_v8 }
  0xe2   :  { %v1552_v7 = vpop.f32.mrf.mxu0  ;;  %v1584_v11 = vpop.f32.mrf.mxu1 }
  0xe3   :  { %v2108_v10 = vadd.f32 %v1552_v7, %v2038_v35  ;;  %v2116_v13 = vadd.f32 %v1584_v11, %v2038_v35 }
  0xe4   :  { %v315_v14 = vpop.f32.mrf.mxu0  ;;  %v443_v18 = vpop.f32.mrf.mxu1 }
  0xe5   :  { %613 = vadd.xlane.f32.xlu1 %v2084_v61  ;;  %611 = vadd.xlane.f32.xlu0 %v2081_v60  ;;  %v2124_v17 = vadd.f32 %v2038_v35, %v315_v14  ;;  %v2132_v22 = vadd.f32 %v2038_v35, %v443_v18 }
  0xe6   :  { %v1555_v15 = vpop.f32.mrf.mxu0  ;;  %v1587_v20 = vpop.f32.mrf.mxu1 }
  0xe7   :  { %v2137_v25 = vadd.f32 %v1555_v15, %v2038_v35  ;;  %v2145_v28 = vadd.f32 %v1587_v20, %v2038_v35 }
  0xe8   :  { %v328_v19 = vpop.f32.mrf.mxu0  ;;  %v456_v24 = vpop.f32.mrf.mxu1 }
  0xe9   :  { %545 = vadd.xlane.f32.xlu1 %v2092_v1  ;;  %543 = vadd.xlane.f32.xlu0 %v2089_v0  ;;  %v2153_v32 = vadd.f32 %v2038_v35, %v328_v19  ;;  %v2161_v40 = vadd.f32 %v2038_v35, %v456_v24 }
  0xea   :  { %v1556_v23 = vpop.f32.mrf.mxu0  ;;  %v1588_v27 = vpop.f32.mrf.mxu1 }
  0xeb   :  { %v2140_v26 = vadd.f32 %v1556_v23, %v2038_v35  ;;  %v2148_v29 = vadd.f32 %v1588_v27, %v2038_v35 }
  0xec   :  { %v331_v30 = vpop.f32.mrf.mxu0  ;;  %v459_v34 = vpop.f32.mrf.mxu1 }
  0xed   :  { %609 = vadd.xlane.f32.xlu1 %v2100_v6  ;;  %607 = vadd.xlane.f32.xlu0 %v2097_v5  ;;  %v2156_v33 = vadd.f32 %v2038_v35, %v331_v30  ;;  %v2164_v41 = vadd.f32 %v2038_v35, %v459_v34 }
  0xee   :  { %v1559_v31 = vpop.f32.mrf.mxu0  ;;  %v1591_v37 = vpop.f32.mrf.mxu1 }
  0xef   :  { %v2169_v46 = vadd.f32 %v1559_v31, %v2038_v35  ;;  %v2177_v51 = vadd.f32 %v1591_v37, %v2038_v35 }
  0xf0   :  { %v344_v36 = vpop.f32.mrf.mxu0  ;;  %v472_v45 = vpop.f32.mrf.mxu1 }
  0xf1   :  { %557 = vadd.xlane.f32.xlu1 %v2108_v10  ;;  %555 = vadd.xlane.f32.xlu0 %v2105_v9  ;;  %v2185_v59 = vadd.f32 %v2038_v35, %v344_v36  ;;  %v2193_v4 = vadd.f32 %v2038_v35, %v472_v45 }
  0xf2   :  { %v1560_v42 = vpop.f32.mrf.mxu0  ;;  %v1592_v50 = vpop.f32.mrf.mxu1 }
  0xf3   :  { %v2172_v47 = vadd.f32 %v1560_v42, %v2038_v35  ;;  %v2180_v52 = vadd.f32 %v1592_v50, %v2038_v35 }
  0xf4   :  { %v347_v55 = vpop.f32.mrf.mxu0  ;;  %v475_v63 = vpop.f32.mrf.mxu1 }
  0xf5   :  { %621 = vadd.xlane.f32.xlu1 %v2116_v13  ;;  %619 = vadd.xlane.f32.xlu0 %v2113_v12  ;;  %v2188_v62 = vadd.f32 %v2038_v35, %v347_v55  ;;  %v2196_v7 = vadd.f32 %v2038_v35, %v475_v63 }
  0xf6   :  { %v1563_v56 = vpop.f32.mrf.mxu0  ;;  %v1595_v3 = vpop.f32.mrf.mxu1 }
  0xf7   :  { %v2201_v14 = vadd.f32 %v1563_v56, %v2038_v35  ;;  %v2209_v19 = vadd.f32 %v1595_v3, %v2038_v35 }
  0xf8   :  { %v360_v2 = vpop.f32.mrf.mxu0  ;;  %v488_v11 = vpop.f32.mrf.mxu1 }
  0xf9   :  { %553 = vadd.xlane.f32.xlu1 %v2124_v17  ;;  %551 = vadd.xlane.f32.xlu0 %v2121_v16  ;;  %v2217_v27 = vadd.f32 %v2038_v35, %v360_v2  ;;  %v2225_v37 = vadd.f32 %v2038_v35, %v488_v11 }
  0xfa   :  { %v1564_v8 = vpop.f32.mrf.mxu0  ;;  %v1596_v18 = vpop.f32.mrf.mxu1 }
  0xfb   :  { %v2204_v15 = vadd.f32 %v1564_v8, %v2038_v35  ;;  %v2212_v20 = vadd.f32 %v1596_v18, %v2038_v35 }
  0xfc   :  { %v363_v23 = vpop.f32.mrf.mxu0  ;;  %v491_v31 = vpop.f32.mrf.mxu1 }
  0xfd   :  { %617 = vadd.xlane.f32.xlu1 %v2132_v22  ;;  %615 = vadd.xlane.f32.xlu0 %v2129_v21  ;;  %v2220_v30 = vadd.f32 %v2038_v35, %v363_v23  ;;  %v2228_v42 = vadd.f32 %v2038_v35, %v491_v31 }
  0xfe   :  { %v1567_v24 = vpop.f32.mrf.mxu0  ;;  %v1599_v36 = vpop.f32.mrf.mxu1 }
  0xff   :  { %v2233_v55 = vadd.f32 %v1567_v24, %v2038_v35  ;;  %v2241_v2 = vadd.f32 %v1599_v36, %v2038_v35 }
 0x100   :  { %v376_v34 = vpop.f32.mrf.mxu0  ;;  %v504_v50 = vpop.f32.mrf.mxu1 }
 0x101   :  { %565 = vadd.xlane.f32.xlu1 %v2140_v26  ;;  %563 = vadd.xlane.f32.xlu0 %v2137_v25  ;;  %2853 = vst [vmem:[#allocation5_spill] sm:$0xff] %v2241_v2  ;;  %v2249_v18 = vadd.f32 %v2038_v35, %v376_v34 }
 0x102   :  { %v1568_v45 = vpop.f32.mrf.mxu0  ;;  %v1600_v63 = vpop.f32.mrf.mxu1 }
 0x103   :  { %v2236_v56 = vadd.f32 %v1568_v45, %v2038_v35  ;;  %v2244_v3 = vadd.f32 %v1600_v63, %v2038_v35  ;;  %2855 = vst [vmem:[#allocation7_spill] sm:$0xff] %v2249_v18  ;;  %v2257_v45 = vadd.f32 %v2038_v35, %v504_v50 }
 0x104   :  { %v379_v8 = vpop.f32.mrf.mxu0  ;;  %v507_v24 = vpop.f32.mrf.mxu1 }
 0x105   :  { %629 = vadd.xlane.f32.xlu1 %v2148_v29  ;;  %627 = vadd.xlane.f32.xlu0 %v2145_v28  ;;  %2854 = vst [vmem:[#allocation6_spill] sm:$0xff] %v2244_v3  ;;  %v2252_v23 = vadd.f32 %v2038_v35, %v379_v8  ;;  %2857 = vst [vmem:[#allocation9_spill] sm:$0xff] %v2257_v45  ;;  %v2260_v63 = vadd.f32 %v2038_v35, %v507_v24 }
 0x106   :  { %v1571_v11 = vpop.f32.mrf.mxu0  ;;  %v1603_v36 = vpop.f32.mrf.mxu1 }
 0x107   :  { %2856 = vst [vmem:[#allocation8_spill] sm:$0xff] %v2252_v23  ;;  %2858 = vst [vmem:[#allocation10_spill] sm:$0xff] %v2260_v63  ;;  %v2273_v24 = vadd.f32 %v1603_v36, %v2038_v35 }
 0x108   :  { %v392_v31 = vpop.f32.mrf.mxu0  ;;  %v520_v8 = vpop.f32.mrf.mxu1 }
 0x109   :  { %561 = vadd.xlane.f32.xlu1 %v2156_v33  ;;  %559 = vadd.xlane.f32.xlu0 %v2153_v32  ;;  %2861 = vst [vmem:[#allocation13_spill] sm:$0xff] %v2273_v24  ;;  %v2289_v36 = vadd.f32 %v2038_v35, %v520_v8 }
 0x10a   :  { %v1572_v34 = vpop.f32.mrf.mxu0  ;;  %v1604_v50 = vpop.f32.mrf.mxu1 }
 0x10b   :  { %2865 = vst [vmem:[#allocation17_spill] sm:$0xff] %v2289_v36 }
 0x10d   :  { %625 = vadd.xlane.f32.xlu1 %v2164_v41  ;;  %623 = vadd.xlane.f32.xlu0 %v2161_v40 }
 0x111   :  { %573 = vadd.xlane.f32.xlu1 %v2172_v47  ;;  %571 = vadd.xlane.f32.xlu0 %v2169_v46 }
 0x115   :  { %637 = vadd.xlane.f32.xlu1 %v2180_v52  ;;  %635 = vadd.xlane.f32.xlu0 %v2177_v51 }
 0x119   :  { %569 = vadd.xlane.f32.xlu1 %v2188_v62  ;;  %567 = vadd.xlane.f32.xlu0 %v2185_v59 }
 0x11d   :  { %633 = vadd.xlane.f32.xlu1 %v2196_v7  ;;  %631 = vadd.xlane.f32.xlu0 %v2193_v4 }
 0x121   :  { %581 = vadd.xlane.f32.xlu1 %v2204_v15  ;;  %579 = vadd.xlane.f32.xlu0 %v2201_v14 }
 0x125   :  { %645 = vadd.xlane.f32.xlu1 %v2212_v20  ;;  %643 = vadd.xlane.f32.xlu0 %v2209_v19 }
 0x129   :  { %577 = vadd.xlane.f32.xlu1 %v2220_v30  ;;  %575 = vadd.xlane.f32.xlu0 %v2217_v27 }
 0x12d   :  { %641 = vadd.xlane.f32.xlu1 %v2228_v42  ;;  %639 = vadd.xlane.f32.xlu0 %v2225_v37 }
 0x131   :  { %589 = vadd.xlane.f32.xlu1 %v2236_v56  ;;  %587 = vadd.xlane.f32.xlu0 %v2233_v55 }
 0x135   :  { %653 = vadd.xlane.f32.xlu1 %v2244_v3  ;;  %651 = vadd.xlane.f32.xlu0 %v2241_v2  ;;  %v2265_v3 = vadd.f32 %v1571_v11, %v2038_v35  ;;  %v2281_v11 = vadd.f32 %v2038_v35, %v392_v31 }
 0x137   :  { %2859 = vst [vmem:[#allocation11_spill] sm:$0xff] %v2265_v3  ;;  %2863 = vst [vmem:[#allocation15_spill] sm:$0xff] %v2281_v11 }
 0x139   :  { %585 = vadd.xlane.f32.xlu1 %v2252_v23  ;;  %583 = vadd.xlane.f32.xlu0 %v2249_v18  ;;  %v2268_v23 = vadd.f32 %v1572_v34, %v2038_v35 }
 0x13b   :  { %2860 = vst [vmem:[#allocation12_spill] sm:$0xff] %v2268_v23 }
 0x13d   :  { %649 = vadd.xlane.f32.xlu1 %v2260_v63  ;;  %647 = vadd.xlane.f32.xlu0 %v2257_v45  ;;  %v2276_v63 = vadd.f32 %v1604_v50, %v2038_v35  ;;  %v395_v45 = vpop.f32.mrf.mxu0 }
 0x13e   :  { %v2284_v34 = vadd.f32 %v2038_v35, %v395_v45 }
 0x13f   :  { %2862 = vst [vmem:[#allocation14_spill] sm:$0xff] %v2276_v63 }
 0x140   :  { %2864 = vst [vmem:[#allocation16_spill] sm:$0xff] %v2284_v34 }
 0x141   :  { %597 = vadd.xlane.f32.xlu1 %v2268_v23  ;;  %595 = vadd.xlane.f32.xlu0 %v2265_v3  ;;  %v523_v23 = vpop.f32.mrf.mxu1 }
 0x142   :  { %v2292_v50 = vadd.f32 %v2038_v35, %v523_v23 }
 0x145   :  { %661 = vadd.xlane.f32.xlu1 %v2276_v63  ;;  %659 = vadd.xlane.f32.xlu0 %v2273_v24 }
 0x149   :  { %593 = vadd.xlane.f32.xlu1 %v2284_v34  ;;  %591 = vadd.xlane.f32.xlu0 %v2281_v11 }
 0x14d   :  { %657 = vadd.xlane.f32.xlu1 %v2292_v50  ;;  %655 = vadd.xlane.f32.xlu0 %v2289_v36 }
 0x15a   :  { %v604_v31 = vpop.xlane.xlu0 %603  ;;  %v540_v24 = vpop.xlane.xlu1 %539 }
 0x15b   :  { %v698_v63 = vmul.f32 0.0078125, %v604_v31  ;;  %v666_v45 = vmul.f32 0.0078125, %v540_v24 }
 0x15d   :  { %v2297_v3 = vsub.f32 %v2041_v38, %v666_v45  ;;  %v2300_v11 = vsub.f32 %v2044_v39, %v698_v63 }
 0x15e   :  { %v542_v34 = vpop.xlane.xlu1 %541  ;;  %v536_v18 = vpop.xlane.xlu0 %535 }
 0x15f   :  { %2866 = vst [vmem:[#allocation18_spill] sm:$0xff] %v2300_v11  ;;  %v667_v8 = vmul.f32 0.0078125, %v542_v34  ;;  %v664_v2 = vmul.f32 0.0078125, %v536_v18  ;;  %v794_v35 = vmul.f32 %v2297_v3, %v2297_v3  ;;  %v826_v38 = vmul.f32 %v2300_v11, %v2300_v11 }
 0x161   :  { %860 = vadd.xlane.f32.xlu0 %v794_v35  ;;  %v2305_v23 = vsub.f32 %v2052_v44, %v667_v8  ;;  %v2312_v63 = vsub.f32 %v2049_v43, %v664_v2 }
 0x162   :  { %v606_v36 = vpop.xlane.xlu1 %605  ;;  %v600_v31 = vpop.xlane.xlu0 %599 }
 0x163   :  { %v699_v24 = vmul.f32 0.0078125, %v606_v36  ;;  %v696_v45 = vmul.f32 0.0078125, %v600_v31  ;;  %v795_v39 = vmul.f32 %v2305_v23, %v2305_v23  ;;  %v792_v31 = vmul.f32 %v2312_v63, %v2312_v63 }
 0x165   :  { %862 = vadd.xlane.f32.xlu1 %v795_v39  ;;  %924 = vadd.xlane.f32.xlu0 %v826_v38  ;;  %v2315_v18 = vsub.f32 %v2060_v49, %v699_v24  ;;  %v2318_v8 = vsub.f32 %v2057_v48, %v696_v45 }
 0x166   :  { %v602_v44 = vpop.xlane.xlu1 %601  ;;  %v538_v34 = vpop.xlane.xlu0 %537 }
 0x167   :  { %v697_v35 = vmul.f32 0.0078125, %v602_v44  ;;  %v665_v11 = vmul.f32 0.0078125, %v538_v34  ;;  %v827_v36 = vmul.f32 %v2315_v18, %v2315_v18  ;;  %v824_v38 = vmul.f32 %v2318_v8, %v2318_v8 }
 0x169   :  { %926 = vadd.xlane.f32.xlu1 %v827_v36  ;;  %856 = vadd.xlane.f32.xlu0 %v792_v31  ;;  %v2325_v43 = vsub.f32 %v2065_v53, %v665_v11  ;;  %v2332_v39 = vsub.f32 %v2068_v54, %v697_v35 }
 0x16a   :  { %v550_v49 = vpop.xlane.xlu1 %549  ;;  %v548_v2 = vpop.xlane.xlu0 %547 }
 0x16b   :  { %v671_v48 = vmul.f32 0.0078125, %v550_v49  ;;  %v670_v24 = vmul.f32 0.0078125, %v548_v2  ;;  %v793_v45 = vmul.f32 %v2325_v43, %v2325_v43  ;;  %v825_v49 = vmul.f32 %v2332_v39, %v2332_v39 }
 0x16d   :  { %920 = vadd.xlane.f32.xlu0 %v824_v38  ;;  %858 = vadd.xlane.f32.xlu1 %v793_v45  ;;  %v2335_v44 = vsub.f32 %v2073_v57, %v670_v24  ;;  %v2338_v34 = vsub.f32 %v2076_v58, %v671_v48 }
 0x16e   :  { %v614_v53 = vpop.xlane.xlu1 %613  ;;  %v612_v11 = vpop.xlane.xlu0 %611 }
 0x16f   :  { %v703_v36 = vmul.f32 0.0078125, %v614_v53  ;;  %v702_v31 = vmul.f32 0.0078125, %v612_v11  ;;  %v798_v2 = vmul.f32 %v2335_v44, %v2335_v44  ;;  %v799_v38 = vmul.f32 %v2338_v34, %v2338_v34 }
 0x171   :  { %922 = vadd.xlane.f32.xlu1 %v825_v49  ;;  %868 = vadd.xlane.f32.xlu0 %v798_v2  ;;  %v2345_v54 = vsub.f32 %v2081_v60, %v702_v31  ;;  %v2352_v45 = vsub.f32 %v2084_v61, %v703_v36 }
 0x172   :  { %v546_v57 = vpop.xlane.xlu1 %545  ;;  %v544_v35 = vpop.xlane.xlu0 %543 }
 0x173   :  { %v669_v58 = vmul.f32 0.0078125, %v546_v57  ;;  %v668_v48 = vmul.f32 0.0078125, %v544_v35  ;;  %v830_v24 = vmul.f32 %v2345_v54, %v2345_v54  ;;  %v831_v57 = vmul.f32 %v2352_v45, %v2352_v45 }
 0x175   :  { %870 = vadd.xlane.f32.xlu1 %v799_v38  ;;  %932 = vadd.xlane.f32.xlu0 %v830_v24  ;;  %v2355_v53 = vsub.f32 %v2089_v0, %v668_v48  ;;  %v2358_v31 = vsub.f32 %v2092_v1, %v669_v58 }
 0x176   :  { %v610_v60 = vpop.xlane.xlu1 %609  ;;  %v608_v11 = vpop.xlane.xlu0 %607 }
 0x177   :  { %v701_v49 = vmul.f32 0.0078125, %v610_v60  ;;  %v700_v2 = vmul.f32 0.0078125, %v608_v11  ;;  %v796_v35 = vmul.f32 %v2355_v53, %v2355_v53  ;;  %v797_v38 = vmul.f32 %v2358_v31, %v2358_v31 }
 0x179   :  { %934 = vadd.xlane.f32.xlu1 %v831_v57  ;;  %864 = vadd.xlane.f32.xlu0 %v796_v35  ;;  %v2365_v61 = vsub.f32 %v2097_v5, %v700_v2  ;;  %v2372_v24 = vsub.f32 %v2100_v6, %v701_v49 }
 0x17a   :  { %v558_v0 = vpop.xlane.xlu1 %557  ;;  %v556_v36 = vpop.xlane.xlu0 %555 }
 0x17b   :  { %v675_v1 = vmul.f32 0.0078125, %v558_v0  ;;  %v674_v58 = vmul.f32 0.0078125, %v556_v36  ;;  %v828_v48 = vmul.f32 %v2365_v61, %v2365_v61  ;;  %v829_v0 = vmul.f32 %v2372_v24, %v2372_v24 }
 0x17d   :  { %866 = vadd.xlane.f32.xlu1 %v797_v38  ;;  %928 = vadd.xlane.f32.xlu0 %v828_v48  ;;  %v2375_v60 = vsub.f32 %v2105_v9, %v674_v58  ;;  %v2378_v2 = vsub.f32 %v2108_v10, %v675_v1 }
 0x17e   :  { %v622_v5 = vpop.xlane.xlu1 %621  ;;  %v620_v11 = vpop.xlane.xlu0 %619 }
 0x17f   :  { %v707_v57 = vmul.f32 0.0078125, %v622_v5  ;;  %v706_v35 = vmul.f32 0.0078125, %v620_v11  ;;  %v802_v36 = vmul.f32 %v2375_v60, %v2375_v60  ;;  %v803_v38 = vmul.f32 %v2378_v2, %v2378_v2 }
 0x181   :  { %930 = vadd.xlane.f32.xlu1 %v829_v0  ;;  %876 = vadd.xlane.f32.xlu0 %v802_v36  ;;  %v2385_v6 = vsub.f32 %v2113_v12, %v706_v35  ;;  %v2392_v48 = vsub.f32 %v2116_v13, %v707_v57 }
 0x182   :  { %v554_v9 = vpop.xlane.xlu1 %553  ;;  %v552_v49 = vpop.xlane.xlu0 %551 }
 0x183   :  { %v673_v10 = vmul.f32 0.0078125, %v554_v9  ;;  %v672_v1 = vmul.f32 0.0078125, %v552_v49  ;;  %v834_v58 = vmul.f32 %v2385_v6, %v2385_v6  ;;  %v835_v9 = vmul.f32 %v2392_v48, %v2392_v48 }
 0x185   :  { %878 = vadd.xlane.f32.xlu1 %v803_v38  ;;  %940 = vadd.xlane.f32.xlu0 %v834_v58  ;;  %v2395_v5 = vsub.f32 %v2121_v16, %v672_v1  ;;  %v2398_v35 = vsub.f32 %v2124_v17, %v673_v10 }
 0x186   :  { %v618_v12 = vpop.xlane.xlu1 %617  ;;  %v616_v11 = vpop.xlane.xlu0 %615 }
 0x187   :  { %v705_v0 = vmul.f32 0.0078125, %v618_v12  ;;  %v704_v36 = vmul.f32 0.0078125, %v616_v11  ;;  %v800_v49 = vmul.f32 %v2395_v5, %v2395_v5  ;;  %v801_v38 = vmul.f32 %v2398_v35, %v2398_v35 }
 0x189   :  { %942 = vadd.xlane.f32.xlu1 %v835_v9  ;;  %872 = vadd.xlane.f32.xlu0 %v800_v49  ;;  %v2405_v13 = vsub.f32 %v2129_v21, %v704_v36  ;;  %v2412_v58 = vsub.f32 %v2132_v22, %v705_v0 }
 0x18a   :  { %v566_v16 = vpop.xlane.xlu1 %565  ;;  %v564_v57 = vpop.xlane.xlu0 %563 }
 0x18b   :  { %v679_v17 = vmul.f32 0.0078125, %v566_v16  ;;  %v678_v10 = vmul.f32 0.0078125, %v564_v57  ;;  %v832_v1 = vmul.f32 %v2405_v13, %v2405_v13  ;;  %v833_v16 = vmul.f32 %v2412_v58, %v2412_v58 }
 0x18d   :  { %874 = vadd.xlane.f32.xlu1 %v801_v38  ;;  %936 = vadd.xlane.f32.xlu0 %v832_v1  ;;  %v2415_v12 = vsub.f32 %v2137_v25, %v678_v10  ;;  %v2418_v36 = vsub.f32 %v2140_v26, %v679_v17 }
 0x18e   :  { %v630_v21 = vpop.xlane.xlu1 %629  ;;  %v628_v11 = vpop.xlane.xlu0 %627 }
 0x18f   :  { %v711_v9 = vmul.f32 0.0078125, %v630_v21  ;;  %v710_v49 = vmul.f32 0.0078125, %v628_v11  ;;  %v806_v57 = vmul.f32 %v2415_v12, %v2415_v12  ;;  %v807_v38 = vmul.f32 %v2418_v36, %v2418_v36 }
 0x191   :  { %938 = vadd.xlane.f32.xlu1 %v833_v16  ;;  %884 = vadd.xlane.f32.xlu0 %v806_v57  ;;  %v2425_v22 = vsub.f32 %v2145_v28, %v710_v49  ;;  %v2432_v1 = vsub.f32 %v2148_v29, %v711_v9 }
 0x192   :  { %v562_v25 = vpop.xlane.xlu1 %561  ;;  %v560_v0 = vpop.xlane.xlu0 %559 }
 0x193   :  { %v677_v26 = vmul.f32 0.0078125, %v562_v25  ;;  %v676_v17 = vmul.f32 0.0078125, %v560_v0  ;;  %v838_v10 = vmul.f32 %v2425_v22, %v2425_v22  ;;  %v839_v25 = vmul.f32 %v2432_v1, %v2432_v1 }
 0x195   :  { %886 = vadd.xlane.f32.xlu1 %v807_v38  ;;  %948 = vadd.xlane.f32.xlu0 %v838_v10  ;;  %v2435_v21 = vsub.f32 %v2153_v32, %v676_v17  ;;  %v2438_v49 = vsub.f32 %v2156_v33, %v677_v26 }
 0x196   :  { %v626_v28 = vpop.xlane.xlu1 %625  ;;  %v624_v11 = vpop.xlane.xlu0 %623 }
 0x197   :  { %v709_v16 = vmul.f32 0.0078125, %v626_v28  ;;  %v708_v57 = vmul.f32 0.0078125, %v624_v11  ;;  %v804_v0 = vmul.f32 %v2435_v21, %v2435_v21  ;;  %v805_v38 = vmul.f32 %v2438_v49, %v2438_v49 }
 0x199   :  { %v2445_v29 = vsub.f32 %v2161_v40, %v708_v57  ;;  %950 = vadd.xlane.f32.xlu1 %v839_v25  ;;  %880 = vadd.xlane.f32.xlu0 %v804_v0  ;;  %v2450_v33 = vsub.f32 %v2164_v41, %v709_v16 }
 0x19a   :  { %v574_v32 = vpop.xlane.xlu1 %573  ;;  %v572_v9 = vpop.xlane.xlu0 %571 }
 0x19b   :  { %v683_v26 = vmul.f32 0.0078125, %v574_v32  ;;  %v682_v17 = vmul.f32 0.0078125, %v572_v9  ;;  %v836_v10 = vmul.f32 %v2445_v29, %v2445_v29  ;;  %v837_v41 = vmul.f32 %v2450_v33, %v2450_v33 }
 0x19d   :  { %v2455_v28 = vsub.f32 %v2169_v46, %v682_v17  ;;  %882 = vadd.xlane.f32.xlu1 %v805_v38  ;;  %944 = vadd.xlane.f32.xlu0 %v836_v10  ;;  %v2458_v40 = vsub.f32 %v2172_v47, %v683_v26 }
 0x19e   :  { %v638_v11 = vpop.xlane.xlu1 %637  ;;  %v636_v57 = vpop.xlane.xlu0 %635 }
 0x19f   :  { %v715_v25 = vmul.f32 0.0078125, %v638_v11  ;;  %v714_v0 = vmul.f32 0.0078125, %v636_v57  ;;  %v810_v16 = vmul.f32 %v2455_v28, %v2455_v28  ;;  %v811_v47 = vmul.f32 %v2458_v40, %v2458_v40 }
 0x1a1   :  { %v2465_v32 = vsub.f32 %v2177_v51, %v714_v0  ;;  %946 = vadd.xlane.f32.xlu1 %v837_v41  ;;  %892 = vadd.xlane.f32.xlu0 %v810_v16  ;;  %v2470_v38 = vsub.f32 %v2180_v52, %v715_v25 }
 0x1a2   :  { %v570_v46 = vpop.xlane.xlu1 %569  ;;  %v568_v9 = vpop.xlane.xlu0 %567 }
 0x1a3   :  { %v681_v26 = vmul.f32 0.0078125, %v570_v46  ;;  %v680_v17 = vmul.f32 0.0078125, %v568_v9  ;;  %v842_v10 = vmul.f32 %v2465_v32, %v2465_v32  ;;  %v843_v52 = vmul.f32 %v2470_v38, %v2470_v38 }
 0x1a5   :  { %v2475_v11 = vsub.f32 %v2185_v59, %v680_v17  ;;  %894 = vadd.xlane.f32.xlu1 %v811_v47  ;;  %956 = vadd.xlane.f32.xlu0 %v842_v10  ;;  %v2478_v51 = vsub.f32 %v2188_v62, %v681_v26 }
 0x1a6   :  { %v634_v57 = vpop.xlane.xlu1 %633  ;;  %v632_v0 = vpop.xlane.xlu0 %631 }
 0x1a7   :  { %v713_v41 = vmul.f32 0.0078125, %v634_v57  ;;  %v712_v16 = vmul.f32 0.0078125, %v632_v0  ;;  %v808_v25 = vmul.f32 %v2475_v11, %v2475_v11  ;;  %v809_v62 = vmul.f32 %v2478_v51, %v2478_v51 }
 0x1a9   :  { %v2485_v46 = vsub.f32 %v2193_v4, %v712_v16  ;;  %958 = vadd.xlane.f32.xlu1 %v843_v52  ;;  %888 = vadd.xlane.f32.xlu0 %v808_v25  ;;  %v2490_v47 = vsub.f32 %v2196_v7, %v713_v41 }
 0x1aa   :  { %v582_v59 = vpop.xlane.xlu1 %581  ;;  %v580_v9 = vpop.xlane.xlu0 %579 }
 0x1ab   :  { %v687_v26 = vmul.f32 0.0078125, %v582_v59  ;;  %v686_v17 = vmul.f32 0.0078125, %v580_v9  ;;  %v840_v10 = vmul.f32 %v2485_v46, %v2485_v46  ;;  %v841_v7 = vmul.f32 %v2490_v47, %v2490_v47 }
 0x1ad   :  { %v2495_v57 = vsub.f32 %v2201_v14, %v686_v17  ;;  %890 = vadd.xlane.f32.xlu1 %v809_v62  ;;  %952 = vadd.xlane.f32.xlu0 %v840_v10  ;;  %v2498_v4 = vsub.f32 %v2204_v15, %v687_v26 }
 0x1ae   :  { %v646_v0 = vpop.xlane.xlu1 %645  ;;  %v644_v16 = vpop.xlane.xlu0 %643 }
 0x1af   :  { %v719_v52 = vmul.f32 0.0078125, %v646_v0  ;;  %v718_v25 = vmul.f32 0.0078125, %v644_v16  ;;  %v814_v41 = vmul.f32 %v2495_v57, %v2495_v57  ;;  %v815_v15 = vmul.f32 %v2498_v4, %v2498_v4 }
 0x1b1   :  { %v2505_v59 = vsub.f32 %v2209_v19, %v718_v25  ;;  %954 = vadd.xlane.f32.xlu1 %v841_v7  ;;  %900 = vadd.xlane.f32.xlu0 %v814_v41  ;;  %v2510_v62 = vsub.f32 %v2212_v20, %v719_v52 }
 0x1b2   :  { %v578_v14 = vpop.xlane.xlu1 %577  ;;  %v576_v9 = vpop.xlane.xlu0 %575 }
 0x1b3   :  { %v685_v26 = vmul.f32 0.0078125, %v578_v14  ;;  %v684_v17 = vmul.f32 0.0078125, %v576_v9  ;;  %v846_v10 = vmul.f32 %v2505_v59, %v2505_v59  ;;  %v847_v20 = vmul.f32 %v2510_v62, %v2510_v62 }
 0x1b5   :  { %v2515_v0 = vsub.f32 %v2217_v27, %v684_v17  ;;  %902 = vadd.xlane.f32.xlu1 %v815_v15  ;;  %964 = vadd.xlane.f32.xlu0 %v846_v10  ;;  %v2518_v19 = vsub.f32 %v2220_v30, %v685_v26 }
 0x1b6   :  { %v642_v16 = vpop.xlane.xlu1 %641  ;;  %v640_v25 = vpop.xlane.xlu0 %639 }
 0x1b7   :  { %2867 = vst [vmem:[#allocation19_spill] sm:$0xff] %v2518_v19  ;;  %v717_v7 = vmul.f32 0.0078125, %v642_v16  ;;  %v716_v41 = vmul.f32 0.0078125, %v640_v25  ;;  %v812_v52 = vmul.f32 %v2515_v0, %v2515_v0  ;;  %v813_v30 = vmul.f32 %v2518_v19, %v2518_v19 }
 0x1b9   :  { %v2525_v14 = vsub.f32 %v2225_v37, %v716_v41  ;;  %966 = vadd.xlane.f32.xlu1 %v847_v20  ;;  %896 = vadd.xlane.f32.xlu0 %v812_v52  ;;  %v2530_v15 = vsub.f32 %v2228_v42, %v717_v7 }
 0x1ba   :  { %v590_v27 = vpop.xlane.xlu1 %589  ;;  %v588_v9 = vpop.xlane.xlu0 %587 }
 0x1bb   :  { %2868 = vst [vmem:[#allocation20_spill] sm:$0xff] %v2525_v14  ;;  %2869 = vst [vmem:[#allocation21_spill] sm:$0xff] %v2530_v15  ;;  %v691_v26 = vmul.f32 0.0078125, %v590_v27  ;;  %v690_v17 = vmul.f32 0.0078125, %v588_v9  ;;  %v844_v10 = vmul.f32 %v2525_v14, %v2525_v14  ;;  %v845_v42 = vmul.f32 %v2530_v15, %v2530_v15  ;;  %v2872_v27 = vld [vmem:[#allocation5_spill] sm:$0xff]  ;;  %v2876_v15 = vld [vmem:[#allocation7_spill] sm:$0xff] }
 0x1bd   :  { %v2535_v16 = vsub.f32 %v2233_v55, %v690_v17  ;;  %898 = vadd.xlane.f32.xlu1 %v813_v30  ;;  %960 = vadd.xlane.f32.xlu0 %v844_v10  ;;  %v2538_v37 = vsub.f32 %v2236_v56, %v691_v26  ;;  %v2874_v26 = vld [vmem:[#allocation6_spill] sm:$0xff] }
 0x1be   :  { %v654_v25 = vpop.xlane.xlu1 %653  ;;  %v652_v41 = vpop.xlane.xlu0 %651 }
 0x1bf   :  { %2870 = vst [vmem:[#allocation22_spill] sm:$0xff] %v2535_v16  ;;  %2871 = vst [vmem:[#allocation23_spill] sm:$0xff] %v2538_v37  ;;  %v723_v20 = vmul.f32 0.0078125, %v654_v25  ;;  %v722_v52 = vmul.f32 0.0078125, %v652_v41  ;;  %v818_v7 = vmul.f32 %v2535_v16, %v2535_v16  ;;  %v819_v56 = vmul.f32 %v2538_v37, %v2538_v37 }
 0x1c1   :  { %v2545_v9 = vsub.f32 %v2872_v27, %v722_v52  ;;  %962 = vadd.xlane.f32.xlu1 %v845_v42  ;;  %908 = vadd.xlane.f32.xlu0 %v818_v7  ;;  %v2550_v17 = vsub.f32 %v2874_v26, %v723_v20  ;;  %v2878_v52 = vld [vmem:[#allocation8_spill] sm:$0xff] }
 0x1c2   :  { %v586_v55 = vpop.xlane.xlu1 %585  ;;  %v584_v30 = vpop.xlane.xlu0 %583 }
 0x1c3   :  { %2873 = vst [vmem:[#allocation5_spill] sm:$0xff] %v2545_v9  ;;  %2875 = vst [vmem:[#allocation6_spill] sm:$0xff] %v2550_v17  ;;  %v689_v10 = vmul.f32 0.0078125, %v586_v55  ;;  %v688_v25 = vmul.f32 0.0078125, %v584_v30  ;;  %v850_v41 = vmul.f32 %v2545_v9, %v2545_v9  ;;  %v851_v20 = vmul.f32 %v2550_v17, %v2550_v17  ;;  %v2880_v30 = vld [vmem:[#allocation9_spill] sm:$0xff]  ;;  %v2884_v17 = vld [vmem:[#allocation11_spill] sm:$0xff] }
 0x1c5   :  { %v2555_v16 = vsub.f32 %v2876_v15, %v688_v25  ;;  %910 = vadd.xlane.f32.xlu1 %v819_v56  ;;  %972 = vadd.xlane.f32.xlu0 %v850_v41  ;;  %v2558_v42 = vsub.f32 %v2878_v52, %v689_v10  ;;  %v2882_v25 = vld [vmem:[#allocation10_spill] sm:$0xff] }
 0x1c6   :  { %v650_v7 = vpop.xlane.xlu1 %649  ;;  %v648_v27 = vpop.xlane.xlu0 %647 }
 0x1c7   :  { %2877 = vst [vmem:[#allocation7_spill] sm:$0xff] %v2555_v16  ;;  %2879 = vst [vmem:[#allocation8_spill] sm:$0xff] %v2558_v42  ;;  %v721_v14 = vmul.f32 0.0078125, %v650_v7  ;;  %v720_v37 = vmul.f32 0.0078125, %v648_v27  ;;  %v816_v55 = vmul.f32 %v2555_v16, %v2555_v16  ;;  %v817_v10 = vmul.f32 %v2558_v42, %v2558_v42 }
 0x1c9   :  { %v2565_v26 = vsub.f32 %v2880_v30, %v720_v37  ;;  %974 = vadd.xlane.f32.xlu1 %v851_v20  ;;  %904 = vadd.xlane.f32.xlu0 %v816_v55  ;;  %v2570_v41 = vsub.f32 %v2882_v25, %v721_v14  ;;  %v2886_v55 = vld [vmem:[#allocation12_spill] sm:$0xff] }
 0x1ca   :  { %v598_v15 = vpop.xlane.xlu1 %597  ;;  %v596_v56 = vpop.xlane.xlu0 %595 }
 0x1cb   :  { %2881 = vst [vmem:[#allocation9_spill] sm:$0xff] %v2565_v26  ;;  %2883 = vst [vmem:[#allocation10_spill] sm:$0xff] %v2570_v41  ;;  %v695_v52 = vmul.f32 0.0078125, %v598_v15  ;;  %v694_v7 = vmul.f32 0.0078125, %v596_v56  ;;  %v848_v27 = vmul.f32 %v2565_v26, %v2565_v26  ;;  %v849_v42 = vmul.f32 %v2570_v41, %v2570_v41 }
 0x1cd   :  { %v2575_v16 = vsub.f32 %v2884_v17, %v694_v7  ;;  %906 = vadd.xlane.f32.xlu1 %v817_v10  ;;  %968 = vadd.xlane.f32.xlu0 %v848_v27  ;;  %v2578_v30 = vsub.f32 %v2886_v55, %v695_v52  ;;  %v2888_v7 = vld [vmem:[#allocation16_spill] sm:$0xff]  ;;  %v2890_v52 = vld [vmem:[#allocation15_spill] sm:$0xff] }
 0x1ce   :  { %v662_v37 = vpop.xlane.xlu1 %661  ;;  %v660_v20 = vpop.xlane.xlu0 %659 }
 0x1cf   :  { %2885 = vst [vmem:[#allocation11_spill] sm:$0xff] %v2575_v16  ;;  %2887 = vst [vmem:[#allocation12_spill] sm:$0xff] %v2578_v30  ;;  %v822_v14 = vmul.f32 %v2575_v16, %v2575_v16  ;;  %v823_v10 = vmul.f32 %v2578_v30, %v2578_v30  ;;  %v727_v41 = vmul.f32 0.0078125, %v662_v37  ;;  %v726_v26 = vmul.f32 0.0078125, %v660_v20  ;;  %v2895_v37 = vld [vmem:[#allocation14_spill] sm:$0xff] }
 0x1d1   :  { %970 = vadd.xlane.f32.xlu1 %v849_v42  ;;  %916 = vadd.xlane.f32.xlu0 %v822_v14  ;;  %v2603_v20 = vsub.f32 %v2895_v37, %v727_v41 }
 0x1d2   :  { %v594_v15 = vpop.xlane.xlu1 %593  ;;  %v592_v56 = vpop.xlane.xlu0 %591 }
 0x1d3   :  { %v693_v25 = vmul.f32 0.0078125, %v594_v15  ;;  %v692_v17 = vmul.f32 0.0078125, %v592_v56  ;;  %2896 = vst [vmem:[#allocation14_spill] sm:$0xff] %v2603_v20 }
 0x1d5   :  { %v2587_v27 = vsub.f32 %v2888_v7, %v693_v25  ;;  %v2590_v55 = vsub.f32 %v2890_v52, %v692_v17  ;;  %918 = vadd.xlane.f32.xlu1 %v823_v10  ;;  %v2893_v25 = vld [vmem:[#allocation17_spill] sm:$0xff] }
 0x1d6   :  { %v658_v9 = vpop.xlane.xlu1 %657  ;;  %v656_v16 = vpop.xlane.xlu0 %655  ;;  %v2897_v17 = vld [vmem:[#allocation13_spill] sm:$0xff] }
 0x1d7   :  { %2889 = vst [vmem:[#allocation16_spill] sm:$0xff] %v2587_v27  ;;  %2891 = vst [vmem:[#allocation15_spill] sm:$0xff] %v2590_v55  ;;  %v725_v42 = vmul.f32 0.0078125, %v658_v9  ;;  %v724_v14 = vmul.f32 0.0078125, %v656_v16  ;;  %v821_v15 = vmul.f32 %v2587_v27, %v2587_v27  ;;  %v820_v56 = vmul.f32 %v2590_v55, %v2590_v55 }
 0x1d8   :  { %v2606_v9 = vsub.f32 %v2897_v17, %v726_v26 }
 0x1d9   :  { %v2597_v30 = vsub.f32 %v2292_v50, %v725_v42  ;;  %v2600_v7 = vsub.f32 %v2893_v25, %v724_v14  ;;  %914 = vadd.xlane.f32.xlu1 %v821_v15  ;;  %912 = vadd.xlane.f32.xlu0 %v820_v56  ;;  %v855_v50 = vmul.f32 %v2603_v20, %v2603_v20 }
 0x1da   :  { %2898 = vst [vmem:[#allocation13_spill] sm:$0xff] %v2606_v9  ;;  %v854_v52 = vmul.f32 %v2606_v9, %v2606_v9 }
 0x1db   :  { %2892 = vst [vmem:[#allocation24_spill] sm:$0xff] %v2597_v30  ;;  %2894 = vst [vmem:[#allocation17_spill] sm:$0xff] %v2600_v7  ;;  %v853_v16 = vmul.f32 %v2597_v30, %v2597_v30  ;;  %v852_v10 = vmul.f32 %v2600_v7, %v2600_v7 }
 0x1dd   :  { %978 = vadd.xlane.f32.xlu1 %v853_v16  ;;  %976 = vadd.xlane.f32.xlu0 %v852_v10 }
 0x1e1   :  { %982 = vadd.xlane.f32.xlu1 %v855_v50  ;;  %980 = vadd.xlane.f32.xlu0 %v854_v52 }
 0x1ea   :  { %v861_v41 = vpop.xlane.xlu0 %860 }
 0x1eb   :  { %v986_v42 = vmul.f32 0.0078125, %v861_v41 }
 0x1ed   :  { %v1050_v26 = vadd.f32 1e-06, %v986_v42 }
 0x1ee   :  { %v863_v14 = vpop.xlane.xlu1 %862  ;;  %v925_v15 = vpop.xlane.xlu0 %924 }
 0x1ef   :  { %1617 = vrsqrt.f32 %v1050_v26  ;;  %v987_v56 = vmul.f32 0.0078125, %v863_v14  ;;  %v1018_v25 = vmul.f32 0.0078125, %v925_v15 }
 0x1f1   :  { %v1051_v37 = vadd.f32 1e-06, %v987_v56  ;;  %v1082_v17 = vadd.f32 1e-06, %v1018_v25 }
 0x1f2   :  { %v927_v16 = vpop.xlane.xlu1 %926  ;;  %v857_v10 = vpop.xlane.xlu0 %856 }
 0x1f3   :  { %1619 = vrsqrt.f32 %v1051_v37  ;;  %v1019_v7 = vmul.f32 0.0078125, %v927_v16  ;;  %v984_v20 = vmul.f32 0.0078125, %v857_v10  ;;  %v2619_v37 = vld [vmem:[%s2817_s3] ss:$0 sm:$0xff] }
 0x1f4   :  { %1621 = vrsqrt.f32 %v1082_v17 }
 0x1f5   :  { %v1083_v30 = vadd.f32 1e-06, %v1019_v7  ;;  %v1048_v9 = vadd.f32 1e-06, %v984_v20 }
 0x1f6   :  { %v859_v50 = vpop.xlane.xlu1 %858  ;;  %v921_v52 = vpop.xlane.xlu0 %920 }
 0x1f7   :  { %1623 = vrsqrt.f32 %v1083_v30  ;;  %v985_v41 = vmul.f32 0.0078125, %v859_v50  ;;  %v1016_v42 = vmul.f32 0.0078125, %v921_v52 }
 0x1f8   :  { %1625 = vrsqrt.f32 %v1048_v9  ;;  %v2625_v9 = vld [vmem:[%s2818_s4] ss:$0 sm:$0xff] }
 0x1f9   :  { %v1049_v55 = vadd.f32 1e-06, %v985_v41  ;;  %v1080_v26 = vadd.f32 1e-06, %v1016_v42 }
 0x1fa   :  { %v923_v14 = vpop.xlane.xlu1 %922  ;;  %v869_v15 = vpop.xlane.xlu0 %868 }
 0x1fb   :  { %1627 = vrsqrt.f32 %v1049_v55  ;;  %v1017_v56 = vmul.f32 0.0078125, %v923_v14  ;;  %v990_v25 = vmul.f32 0.0078125, %v869_v15  ;;  %v2899_v14 = vld [vmem:[#allocation18_spill] sm:$0xff] }
 0x1fc   :  { %v1618_v27 = vpop.eup %1617  ;;  %1629 = vrsqrt.f32 %v1080_v26 }
 0x1fd   :  { %v1178_v7 = vmul.f32 %v1618_v27, %v2297_v3  ;;  %v1081_v30 = vadd.f32 1e-06, %v1017_v56  ;;  %v1054_v20 = vadd.f32 1e-06, %v990_v25 }
 0x1fe   :  { %v871_v17 = vpop.xlane.xlu1 %870  ;;  %v933_v55 = vpop.xlane.xlu0 %932 }
 0x1ff   :  { %v1249_v16 = vmul.f32 %v2619_v37, %v1178_v7  ;;  %1631 = vrsqrt.f32 %v1081_v30  ;;  %v991_v10 = vmul.f32 0.0078125, %v871_v17  ;;  %v1022_v50 = vmul.f32 0.0078125, %v933_v55 }
 0x200   :  { %v1620_v52 = vpop.eup %1619  ;;  %1633 = vrsqrt.f32 %v1054_v20 }
 0x201   :  { %v1622_v41 = vpop.eup %1621  ;;  %v1320_v42 = vadd.f32 %v2625_v9, %v1249_v16  ;;  %v1179_v3 = vmul.f32 %v1620_v52, %v2305_v23  ;;  %v1055_v27 = vadd.f32 1e-06, %v991_v10  ;;  %v1086_v26 = vadd.f32 1e-06, %v1022_v50 }
 0x202   :  { %v1210_v15 = vmul.f32 %v1622_v41, %v2899_v14  ;;  %v935_v56 = vpop.xlane.xlu1 %934  ;;  %v865_v25 = vpop.xlane.xlu0 %864 }
 0x203   :  { %1384 = vst [vmem:[#allocation2 + $0x10] sm:$0xff] %v1320_v42  ;;  %v1250_v19 = vmul.f32 %v2619_v37, %v1179_v3  ;;  %1635 = vrsqrt.f32 %v1055_v27  ;;  %v1023_v7 = vmul.f32 0.0078125, %v935_v56  ;;  %v988_v30 = vmul.f32 0.0078125, %v865_v25 }
 0x204   :  { %v1624_v17 = vpop.eup %1623  ;;  %v1281_v20 = vmul.f32 %v2619_v37, %v1210_v15  ;;  %1637 = vrsqrt.f32 %v1086_v26 }
 0x205   :  { %v1626_v55 = vpop.eup %1625  ;;  %v1321_v16 = vadd.f32 %v2625_v9, %v1250_v19  ;;  %v1211_v23 = vmul.f32 %v1624_v17, %v2315_v18  ;;  %v1087_v10 = vadd.f32 1e-06, %v1023_v7  ;;  %v1052_v50 = vadd.f32 1e-06, %v988_v30 }
 0x206   :  { %v1352_v52 = vadd.f32 %v2625_v9, %v1281_v20  ;;  %v1176_v41 = vmul.f32 %v1626_v55, %v2312_v63  ;;  %v867_v42 = vpop.xlane.xlu1 %866  ;;  %v929_v3 = vpop.xlane.xlu0 %928 }
 0x207   :  { %1385 = vst [vmem:[#allocation2 + $0x18] sm:$0xff] %v1321_v16  ;;  %v1282_v27 = vmul.f32 %v2619_v37, %v1211_v23  ;;  %1639 = vrsqrt.f32 %v1087_v10  ;;  %v989_v14 = vmul.f32 0.0078125, %v867_v42  ;;  %v1020_v15 = vmul.f32 0.0078125, %v929_v3 }
 0x208   :  { %v1628_v26 = vpop.eup %1627  ;;  %1416 = vst [vmem:[#allocation2 + $0x110] sm:$0xff] %v1352_v52  ;;  %v1247_v19 = vmul.f32 %v2619_v37, %v1176_v41  ;;  %1641 = vrsqrt.f32 %v1052_v50 }
 0x209   :  { %v1630_v18 = vpop.eup %1629  ;;  %v1353_v56 = vadd.f32 %v2625_v9, %v1282_v27  ;;  %v1177_v25 = vmul.f32 %v1628_v26, %v2325_v43  ;;  %v1053_v7 = vadd.f32 1e-06, %v989_v14  ;;  %v1084_v63 = vadd.f32 1e-06, %v1020_v15 }
 0x20a   :  { %v1318_v30 = vadd.f32 %v2625_v9, %v1247_v19  ;;  %v1208_v17 = vmul.f32 %v1630_v18, %v2318_v8  ;;  %v931_v20 = vpop.xlane.xlu1 %930  ;;  %v877_v55 = vpop.xlane.xlu0 %876 }
 0x20b   :  { %1417 = vst [vmem:[#allocation2 + $0x118] sm:$0xff] %v1353_v56  ;;  %v1248_v16 = vmul.f32 %v2619_v37, %v1177_v25  ;;  %1643 = vrsqrt.f32 %v1053_v7  ;;  %v1021_v23 = vmul.f32 0.0078125, %v931_v20  ;;  %v994_v10 = vmul.f32 0.0078125, %v877_v55 }
 0x20c   :  { %v1632_v50 = vpop.eup %1631  ;;  %1382 = vst [vmem:[#allocation2] sm:$0xff] %v1318_v30  ;;  %v1279_v52 = vmul.f32 %v2619_v37, %v1208_v17  ;;  %1645 = vrsqrt.f32 %v1084_v63 }
 0x20d   :  { %v1634_v43 = vpop.eup %1633  ;;  %v1319_v41 = vadd.f32 %v2625_v9, %v1248_v16  ;;  %v1209_v42 = vmul.f32 %v1632_v50, %v2332_v39  ;;  %v1085_v3 = vadd.f32 1e-06, %v1021_v23  ;;  %v1058_v8 = vadd.f32 1e-06, %v994_v10 }
 0x20e   :  { %v1350_v27 = vadd.f32 %v2625_v9, %v1279_v52  ;;  %v1182_v14 = vmul.f32 %v1634_v43, %v2335_v44  ;;  %v879_v15 = vpop.xlane.xlu1 %878  ;;  %v941_v26 = vpop.xlane.xlu0 %940 }
 0x20f   :  { %1383 = vst [vmem:[#allocation2 + $0x8] sm:$0xff] %v1319_v41  ;;  %v1280_v19 = vmul.f32 %v2619_v37, %v1209_v42  ;;  %1647 = vrsqrt.f32 %v1085_v3  ;;  %v995_v18 = vmul.f32 0.0078125, %v879_v15  ;;  %v1026_v56 = vmul.f32 0.0078125, %v941_v26 }
 0x210   :  { %v1636_v25 = vpop.eup %1635  ;;  %1414 = vst [vmem:[#allocation2 + $0x100] sm:$0xff] %v1350_v27  ;;  %v1253_v7 = vmul.f32 %v2619_v37, %v1182_v14  ;;  %1649 = vrsqrt.f32 %v1058_v8 }
 0x211   :  { %v1638_v39 = vpop.eup %1637  ;;  %v1351_v63 = vadd.f32 %v2625_v9, %v1280_v19  ;;  %v1183_v30 = vmul.f32 %v1636_v25, %v2338_v34  ;;  %v1059_v17 = vadd.f32 1e-06, %v995_v18  ;;  %v1090_v44 = vadd.f32 1e-06, %v1026_v56 }
 0x212   :  { %v1324_v20 = vadd.f32 %v2625_v9, %v1253_v7  ;;  %v1214_v55 = vmul.f32 %v1638_v39, %v2345_v54  ;;  %v943_v16 = vpop.xlane.xlu1 %942  ;;  %v873_v23 = vpop.xlane.xlu0 %872 }
 0x213   :  { %1415 = vst [vmem:[#allocation2 + $0x108] sm:$0xff] %v1351_v63  ;;  %v1254_v10 = vmul.f32 %v2619_v37, %v1183_v30  ;;  %1651 = vrsqrt.f32 %v1059_v17  ;;  %v1027_v50 = vmul.f32 0.0078125, %v943_v16  ;;  %v992_v52 = vmul.f32 0.0078125, %v873_v23 }
 0x214   :  { %v1640_v43 = vpop.eup %1639  ;;  %1388 = vst [vmem:[#allocation2 + $0x30] sm:$0xff] %v1324_v20  ;;  %v1285_v41 = vmul.f32 %v2619_v37, %v1214_v55  ;;  %1653 = vrsqrt.f32 %v1090_v44 }
 0x215   :  { %v1642_v34 = vpop.eup %1641  ;;  %v1325_v42 = vadd.f32 %v2625_v9, %v1254_v10  ;;  %v1215_v3 = vmul.f32 %v1640_v43, %v2352_v45  ;;  %v1091_v8 = vadd.f32 1e-06, %v1027_v50  ;;  %v1056_v54 = vadd.f32 1e-06, %v992_v52 }
 0x216   :  { %v1356_v27 = vadd.f32 %v2625_v9, %v1285_v41  ;;  %v1180_v14 = vmul.f32 %v1642_v34, %v2355_v53  ;;  %v875_v15 = vpop.xlane.xlu1 %874  ;;  %v937_v26 = vpop.xlane.xlu0 %936 }
 0x217   :  { %1389 = vst [vmem:[#allocation2 + $0x38] sm:$0xff] %v1325_v42  ;;  %v1286_v19 = vmul.f32 %v2619_v37, %v1215_v3  ;;  %1655 = vrsqrt.f32 %v1091_v8  ;;  %v993_v18 = vmul.f32 0.0078125, %v875_v15  ;;  %v1024_v56 = vmul.f32 0.0078125, %v937_v26 }
 0x218   :  { %v1644_v25 = vpop.eup %1643  ;;  %1420 = vst [vmem:[#allocation2 + $0x130] sm:$0xff] %v1356_v27  ;;  %v1251_v7 = vmul.f32 %v2619_v37, %v1180_v14  ;;  %1657 = vrsqrt.f32 %v1056_v54 }
 0x219   :  { %v1646_v45 = vpop.eup %1645  ;;  %v1357_v39 = vadd.f32 %v2625_v9, %v1286_v19  ;;  %v1181_v63 = vmul.f32 %v1644_v25, %v2358_v31  ;;  %v1057_v30 = vadd.f32 1e-06, %v993_v18  ;;  %v1088_v53 = vadd.f32 1e-06, %v1024_v56 }
 0x21a   :  { %v1322_v17 = vadd.f32 %v2625_v9, %v1251_v7  ;;  %v1212_v44 = vmul.f32 %v1646_v45, %v2365_v61  ;;  %v939_v20 = vpop.xlane.xlu1 %938  ;;  %v885_v55 = vpop.xlane.xlu0 %884 }
 0x21b   :  { %1421 = vst [vmem:[#allocation2 + $0x138] sm:$0xff] %v1357_v39  ;;  %v1252_v16 = vmul.f32 %v2619_v37, %v1181_v63  ;;  %1659 = vrsqrt.f32 %v1057_v30  ;;  %v1025_v23 = vmul.f32 0.0078125, %v939_v20  ;;  %v998_v10 = vmul.f32 0.0078125, %v885_v55 }
 0x21c   :  { %v1648_v50 = vpop.eup %1647  ;;  %1386 = vst [vmem:[#allocation2 + $0x20] sm:$0xff] %v1322_v17  ;;  %v1283_v52 = vmul.f32 %v2619_v37, %v1212_v44  ;;  %1661 = vrsqrt.f32 %v1088_v53 }
 0x21d   :  { %v1650_v31 = vpop.eup %1649  ;;  %v1323_v43 = vadd.f32 %v2625_v9, %v1252_v16  ;;  %v1213_v41 = vmul.f32 %v1648_v50, %v2372_v24  ;;  %v1089_v34 = vadd.f32 1e-06, %v1025_v23  ;;  %v1062_v61 = vadd.f32 1e-06, %v998_v10 }
 0x21e   :  { %v1354_v42 = vadd.f32 %v2625_v9, %v1283_v52  ;;  %v1186_v3 = vmul.f32 %v1650_v31, %v2375_v60  ;;  %v887_v8 = vpop.xlane.xlu1 %886  ;;  %v949_v54 = vpop.xlane.xlu0 %948 }
 0x21f   :  { %1387 = vst [vmem:[#allocation2 + $0x28] sm:$0xff] %v1323_v43  ;;  %v1284_v27 = vmul.f32 %v2619_v37, %v1213_v41  ;;  %1663 = vrsqrt.f32 %v1089_v34  ;;  %v999_v14 = vmul.f32 0.0078125, %v887_v8  ;;  %v1030_v15 = vmul.f32 0.0078125, %v949_v54 }
 0x220   :  { %v1652_v26 = vpop.eup %1651  ;;  %1418 = vst [vmem:[#allocation2 + $0x120] sm:$0xff] %v1354_v42  ;;  %v1257_v19 = vmul.f32 %v2619_v37, %v1186_v3  ;;  %1665 = vrsqrt.f32 %v1062_v61 }
 0x221   :  { %v1654_v24 = vpop.eup %1653  ;;  %v1355_v18 = vadd.f32 %v2625_v9, %v1284_v27  ;;  %v1187_v56 = vmul.f32 %v1652_v26, %v2378_v2  ;;  %v1063_v25 = vadd.f32 1e-06, %v999_v14  ;;  %v1094_v60 = vadd.f32 1e-06, %v1030_v15 }
 0x222   :  { %v1328_v7 = vadd.f32 %v2625_v9, %v1257_v19  ;;  %v1218_v45 = vmul.f32 %v1654_v24, %v2385_v6  ;;  %v951_v39 = vpop.xlane.xlu1 %950  ;;  %v881_v63 = vpop.xlane.xlu0 %880 }
 0x223   :  { %1419 = vst [vmem:[#allocation2 + $0x128] sm:$0xff] %v1355_v18  ;;  %v1258_v30 = vmul.f32 %v2619_v37, %v1187_v56  ;;  %1667 = vrsqrt.f32 %v1063_v25  ;;  %v1031_v53 = vmul.f32 0.0078125, %v951_v39  ;;  %v996_v17 = vmul.f32 0.0078125, %v881_v63 }
 0x224   :  { %v1656_v44 = vpop.eup %1655  ;;  %1392 = vst [vmem:[#allocation2 + $0x50] sm:$0xff] %v1328_v7  ;;  %v1289_v20 = vmul.f32 %v2619_v37, %v1218_v45  ;;  %1669 = vrsqrt.f32 %v1094_v60 }
 0x225   :  { %v1658_v2 = vpop.eup %1657  ;;  %v1329_v55 = vadd.f32 %v2625_v9, %v1258_v30  ;;  %v1219_v16 = vmul.f32 %v1656_v44, %v2392_v48  ;;  %v1095_v23 = vadd.f32 1e-06, %v1031_v53  ;;  %v1060_v6 = vadd.f32 1e-06, %v996_v17 }
 0x226   :  { %v1360_v10 = vadd.f32 %v2625_v9, %v1289_v20  ;;  %v1184_v50 = vmul.f32 %v1658_v2, %v2395_v5  ;;  %v883_v52 = vpop.xlane.xlu1 %882  ;;  %v945_v31 = vpop.xlane.xlu0 %944 }
 0x227   :  { %1393 = vst [vmem:[#allocation2 + $0x58] sm:$0xff] %v1329_v55  ;;  %v1290_v43 = vmul.f32 %v2619_v37, %v1219_v16  ;;  %1671 = vrsqrt.f32 %v1095_v23  ;;  %v997_v41 = vmul.f32 0.0078125, %v883_v52  ;;  %v1028_v34 = vmul.f32 0.0078125, %v945_v31 }
 0x228   :  { %v1660_v61 = vpop.eup %1659  ;;  %1424 = vst [vmem:[#allocation2 + $0x150] sm:$0xff] %v1360_v10  ;;  %v1255_v42 = vmul.f32 %v2619_v37, %v1184_v50  ;;  %1673 = vrsqrt.f32 %v1060_v6 }
 0x229   :  { %v1662_v48 = vpop.eup %1661  ;;  %v1361_v3 = vadd.f32 %v2625_v9, %v1290_v43  ;;  %v1185_v8 = vmul.f32 %v1660_v61, %v2398_v35  ;;  %v1061_v54 = vadd.f32 1e-06, %v997_v41  ;;  %v1092_v5 = vadd.f32 1e-06, %v1028_v34 }
 0x22a   :  { %v1326_v27 = vadd.f32 %v2625_v9, %v1255_v42  ;;  %v1216_v14 = vmul.f32 %v1662_v48, %v2405_v13  ;;  %v947_v15 = vpop.xlane.xlu1 %946  ;;  %v893_v26 = vpop.xlane.xlu0 %892 }
 0x22b   :  { %1425 = vst [vmem:[#allocation2 + $0x158] sm:$0xff] %v1361_v3  ;;  %v1256_v19 = vmul.f32 %v2619_v37, %v1185_v8  ;;  %1675 = vrsqrt.f32 %v1061_v54  ;;  %v1029_v24 = vmul.f32 0.0078125, %v947_v15  ;;  %v1002_v18 = vmul.f32 0.0078125, %v893_v26 }
 0x22c   :  { %v1664_v56 = vpop.eup %1663  ;;  %1390 = vst [vmem:[#allocation2 + $0x40] sm:$0xff] %v1326_v27  ;;  %v1287_v25 = vmul.f32 %v2619_v37, %v1216_v14  ;;  %1677 = vrsqrt.f32 %v1092_v5 }
 0x22d   :  { %v1666_v35 = vpop.eup %1665  ;;  %v1327_v60 = vadd.f32 %v2625_v9, %v1256_v19  ;;  %v1217_v7 = vmul.f32 %v1664_v56, %v2412_v58  ;;  %v1093_v45 = vadd.f32 1e-06, %v1029_v24  ;;  %v1066_v13 = vadd.f32 1e-06, %v1002_v18 }
 0x22e   :  { %v1358_v39 = vadd.f32 %v2625_v9, %v1287_v25  ;;  %v1190_v63 = vmul.f32 %v1666_v35, %v2415_v12  ;;  %v895_v30 = vpop.xlane.xlu1 %894  ;;  %v957_v53 = vpop.xlane.xlu0 %956 }
 0x22f   :  { %1391 = vst [vmem:[#allocation2 + $0x48] sm:$0xff] %v1327_v60  ;;  %v1288_v17 = vmul.f32 %v2619_v37, %v1217_v7  ;;  %1679 = vrsqrt.f32 %v1093_v45  ;;  %v1003_v44 = vmul.f32 0.0078125, %v895_v30  ;;  %v1034_v20 = vmul.f32 0.0078125, %v957_v53 }
 0x230   :  { %v1668_v2 = vpop.eup %1667  ;;  %1422 = vst [vmem:[#allocation2 + $0x140] sm:$0xff] %v1358_v39  ;;  %v1261_v55 = vmul.f32 %v2619_v37, %v1190_v63  ;;  %1681 = vrsqrt.f32 %v1066_v13 }
 0x231   :  { %v1670_v58 = vpop.eup %1669  ;;  %v1359_v16 = vadd.f32 %v2625_v9, %v1288_v17  ;;  %v1191_v23 = vmul.f32 %v1668_v2, %v2418_v36  ;;  %v1067_v6 = vadd.f32 1e-06, %v1003_v44  ;;  %v1098_v12 = vadd.f32 1e-06, %v1034_v20 }
 0x232   :  { %v1332_v10 = vadd.f32 %v2625_v9, %v1261_v55  ;;  %v1222_v50 = vmul.f32 %v1670_v58, %v2425_v22  ;;  %v959_v52 = vpop.xlane.xlu1 %958  ;;  %v889_v31 = vpop.xlane.xlu0 %888 }
 0x233   :  { %1423 = vst [vmem:[#allocation2 + $0x148] sm:$0xff] %v1359_v16  ;;  %v1262_v43 = vmul.f32 %v2619_v37, %v1191_v23  ;;  %1683 = vrsqrt.f32 %v1067_v6  ;;  %v1035_v41 = vmul.f32 0.0078125, %v959_v52  ;;  %v1000_v34 = vmul.f32 0.0078125, %v889_v31 }
 0x234   :  { %v1672_v61 = vpop.eup %1671  ;;  %1396 = vst [vmem:[#allocation2 + $0x70] sm:$0xff] %v1332_v10  ;;  %v1293_v42 = vmul.f32 %v2619_v37, %v1222_v50  ;;  %1685 = vrsqrt.f32 %v1098_v12 }
 0x235   :  { %v1674_v36 = vpop.eup %1673  ;;  %v1333_v48 = vadd.f32 %v2625_v9, %v1262_v43  ;;  %v1223_v3 = vmul.f32 %v1672_v61, %v2432_v1  ;;  %v1099_v8 = vadd.f32 1e-06, %v1035_v41  ;;  %v1064_v22 = vadd.f32 1e-06, %v1000_v34 }
 0x236   :  { %v1364_v54 = vadd.f32 %v2625_v9, %v1293_v42  ;;  %v1188_v5 = vmul.f32 %v1674_v36, %v2435_v21  ;;  %v891_v27 = vpop.xlane.xlu1 %890  ;;  %v953_v14 = vpop.xlane.xlu0 %952 }
 0x237   :  { %1397 = vst [vmem:[#allocation2 + $0x78] sm:$0xff] %v1333_v48  ;;  %v1294_v15 = vmul.f32 %v2619_v37, %v1223_v3  ;;  %1687 = vrsqrt.f32 %v1099_v8  ;;  %v1001_v26 = vmul.f32 0.0078125, %v891_v27  ;;  %v1032_v19 = vmul.f32 0.0078125, %v953_v14 }
 0x238   :  { %v1676_v24 = vpop.eup %1675  ;;  %1428 = vst [vmem:[#allocation2 + $0x170] sm:$0xff] %v1364_v54  ;;  %v1259_v18 = vmul.f32 %v2619_v37, %v1188_v5  ;;  %1689 = vrsqrt.f32 %v1064_v22 }
 0x239   :  { %v1678_v1 = vpop.eup %1677  ;;  %v1365_v56 = vadd.f32 %v2625_v9, %v1294_v15  ;;  %v1189_v25 = vmul.f32 %v1676_v24, %v2438_v49  ;;  %v1065_v35 = vadd.f32 1e-06, %v1001_v26  ;;  %v1096_v21 = vadd.f32 1e-06, %v1032_v19 }
 0x23a   :  { %v1330_v60 = vadd.f32 %v2625_v9, %v1259_v18  ;;  %v1220_v7 = vmul.f32 %v1678_v1, %v2445_v29  ;;  %v955_v45 = vpop.xlane.xlu1 %954  ;;  %v901_v13 = vpop.xlane.xlu0 %900 }
 0x23b   :  { %1429 = vst [vmem:[#allocation2 + $0x178] sm:$0xff] %v1365_v56  ;;  %v1260_v39 = vmul.f32 %v2619_v37, %v1189_v25  ;;  %1691 = vrsqrt.f32 %v1065_v35  ;;  %v1033_v63 = vmul.f32 0.0078125, %v955_v45  ;;  %v1006_v30 = vmul.f32 0.0078125, %v901_v13 }
 0x23c   :  { %v1680_v53 = vpop.eup %1679  ;;  %1394 = vst [vmem:[#allocation2 + $0x60] sm:$0xff] %v1330_v60  ;;  %v1291_v17 = vmul.f32 %v2619_v37, %v1220_v7  ;;  %1693 = vrsqrt.f32 %v1096_v21 }
 0x23d   :  { %v1682_v49 = vpop.eup %1681  ;;  %v1331_v44 = vadd.f32 %v2625_v9, %v1260_v39  ;;  %v1221_v20 = vmul.f32 %v1680_v53, %v2450_v33  ;;  %v1097_v2 = vadd.f32 1e-06, %v1033_v63  ;;  %v1070_v29 = vadd.f32 1e-06, %v1006_v30 }
 0x23e   :  { %v1362_v55 = vadd.f32 %v2625_v9, %v1291_v17  ;;  %v1194_v58 = vmul.f32 %v1682_v49, %v2455_v28  ;;  %v903_v16 = vpop.xlane.xlu1 %902  ;;  %v965_v23 = vpop.xlane.xlu0 %964 }
 0x23f   :  { %1395 = vst [vmem:[#allocation2 + $0x68] sm:$0xff] %v1331_v44  ;;  %v1292_v6 = vmul.f32 %v2619_v37, %v1221_v20  ;;  %1695 = vrsqrt.f32 %v1097_v2  ;;  %v1007_v12 = vmul.f32 0.0078125, %v903_v16  ;;  %v1038_v10 = vmul.f32 0.0078125, %v965_v23 }
 0x240   :  { %v1684_v50 = vpop.eup %1683  ;;  %1426 = vst [vmem:[#allocation2 + $0x160] sm:$0xff] %v1362_v55  ;;  %v1265_v52 = vmul.f32 %v2619_v37, %v1194_v58  ;;  %1697 = vrsqrt.f32 %v1070_v29 }
 0x241   :  { %v1686_v33 = vpop.eup %1685  ;;  %v1363_v31 = vadd.f32 %v2625_v9, %v1292_v6  ;;  %v1195_v43 = vmul.f32 %v1684_v50, %v2458_v40  ;;  %v1071_v41 = vadd.f32 1e-06, %v1007_v12  ;;  %v1102_v28 = vadd.f32 1e-06, %v1038_v10 }
 0x242   :  { %v1336_v34 = vadd.f32 %v2625_v9, %v1265_v52  ;;  %v1226_v61 = vmul.f32 %v1686_v33, %v2465_v32  ;;  %v967_v42 = vpop.xlane.xlu1 %966  ;;  %v897_v36 = vpop.xlane.xlu0 %896 }
 0x243   :  { %1427 = vst [vmem:[#allocation2 + $0x168] sm:$0xff] %v1363_v31  ;;  %v1266_v48 = vmul.f32 %v2619_v37, %v1195_v43  ;;  %1699 = vrsqrt.f32 %v1071_v41  ;;  %v1039_v3 = vmul.f32 0.0078125, %v967_v42  ;;  %v1004_v8 = vmul.f32 0.0078125, %v897_v36 }
 0x244   :  { %v1688_v22 = vpop.eup %1687  ;;  %1400 = vst [vmem:[#allocation2 + $0x90] sm:$0xff] %v1336_v34  ;;  %v1297_v54 = vmul.f32 %v2619_v37, %v1226_v61  ;;  %1701 = vrsqrt.f32 %v1102_v28 }
 0x245   :  { %v1690_v40 = vpop.eup %1689  ;;  %v1337_v5 = vadd.f32 %v2625_v9, %v1266_v48  ;;  %v1227_v27 = vmul.f32 %v1688_v22, %v2470_v38  ;;  %v1103_v14 = vadd.f32 1e-06, %v1039_v3  ;;  %v1068_v32 = vadd.f32 1e-06, %v1004_v8 }
 0x246   :  { %v1368_v15 = vadd.f32 %v2625_v9, %v1297_v54  ;;  %v1192_v26 = vmul.f32 %v1690_v40, %v2475_v11  ;;  %v899_v19 = vpop.xlane.xlu1 %898  ;;  %v961_v24 = vpop.xlane.xlu0 %960 }
 0x247   :  { %1401 = vst [vmem:[#allocation2 + $0x98] sm:$0xff] %v1337_v5  ;;  %v1298_v18 = vmul.f32 %v2619_v37, %v1227_v27  ;;  %1703 = vrsqrt.f32 %v1103_v14  ;;  %v1005_v1 = vmul.f32 0.0078125, %v899_v19  ;;  %v1036_v56 = vmul.f32 0.0078125, %v961_v24 }
 0x248   :  { %v1692_v25 = vpop.eup %1691  ;;  %1432 = vst [vmem:[#allocation2 + $0x190] sm:$0xff] %v1368_v15  ;;  %v1263_v35 = vmul.f32 %v2619_v37, %v1192_v26  ;;  %1705 = vrsqrt.f32 %v1068_v32 }
 0x249   :  { %v1694_v38 = vpop.eup %1693  ;;  %v1369_v21 = vadd.f32 %v2625_v9, %v1298_v18  ;;  %v1193_v60 = vmul.f32 %v1692_v25, %v2478_v51  ;;  %v1069_v7 = vadd.f32 1e-06, %v1005_v1  ;;  %v1100_v11 = vadd.f32 1e-06, %v1036_v56  ;;  %v2900_v56 = vld [vmem:[#allocation19_spill] sm:$0xff] }
 0x24a   :  { %v1334_v45 = vadd.f32 %v2625_v9, %v1263_v35  ;;  %v1224_v13 = vmul.f32 %v1694_v38, %v2485_v46  ;;  %v963_v39 = vpop.xlane.xlu1 %962  ;;  %v909_v63 = vpop.xlane.xlu0 %908 }
 0x24b   :  { %1433 = vst [vmem:[#allocation2 + $0x198] sm:$0xff] %v1369_v21  ;;  %v1264_v30 = vmul.f32 %v2619_v37, %v1193_v60  ;;  %1707 = vrsqrt.f32 %v1069_v7  ;;  %v1037_v53 = vmul.f32 0.0078125, %v963_v39  ;;  %v1010_v17 = vmul.f32 0.0078125, %v909_v63  ;;  %v2901_v21 = vld [vmem:[#allocation20_spill] sm:$0xff] }
 0x24c   :  { %v1696_v49 = vpop.eup %1695  ;;  %1398 = vst [vmem:[#allocation2 + $0x80] sm:$0xff] %v1334_v45  ;;  %v1295_v44 = vmul.f32 %v2619_v37, %v1224_v13  ;;  %1709 = vrsqrt.f32 %v1100_v11 }
 0x24d   :  { %v1698_v51 = vpop.eup %1697  ;;  %v1335_v20 = vadd.f32 %v2625_v9, %v1264_v30  ;;  %v1225_v2 = vmul.f32 %v1696_v49, %v2490_v47  ;;  %v1101_v29 = vadd.f32 1e-06, %v1037_v53  ;;  %v1074_v46 = vadd.f32 1e-06, %v1010_v17  ;;  %v2902_v49 = vld [vmem:[#allocation21_spill] sm:$0xff] }
 0x24e   :  { %v1366_v55 = vadd.f32 %v2625_v9, %v1295_v44  ;;  %v1198_v58 = vmul.f32 %v1698_v51, %v2495_v57  ;;  %v911_v16 = vpop.xlane.xlu1 %910  ;;  %v973_v23 = vpop.xlane.xlu0 %972 }
 0x24f   :  { %1399 = vst [vmem:[#allocation2 + $0x88] sm:$0xff] %v1335_v20  ;;  %v1296_v6 = vmul.f32 %v2619_v37, %v1225_v2  ;;  %1711 = vrsqrt.f32 %v1101_v29  ;;  %v1011_v12 = vmul.f32 0.0078125, %v911_v16  ;;  %v1042_v10 = vmul.f32 0.0078125, %v973_v23  ;;  %v2903_v29 = vld [vmem:[#allocation22_spill] sm:$0xff] }
 0x250   :  { %v1700_v50 = vpop.eup %1699  ;;  %1430 = vst [vmem:[#allocation2 + $0x180] sm:$0xff] %v1366_v55  ;;  %v1269_v52 = vmul.f32 %v2619_v37, %v1198_v58  ;;  %1713 = vrsqrt.f32 %v1074_v46 }
 0x251   :  { %v1702_v47 = vpop.eup %1701  ;;  %v1367_v33 = vadd.f32 %v2625_v9, %v1296_v6  ;;  %v1199_v31 = vmul.f32 %v1700_v50, %v2498_v4  ;;  %v1075_v43 = vadd.f32 1e-06, %v1011_v12  ;;  %v1106_v57 = vadd.f32 1e-06, %v1042_v10  ;;  %v2904_v50 = vld [vmem:[#allocation23_spill] sm:$0xff] }
 0x252   :  { %v1340_v41 = vadd.f32 %v2625_v9, %v1269_v52  ;;  %v1230_v28 = vmul.f32 %v1702_v47, %v2505_v59  ;;  %v975_v34 = vpop.xlane.xlu1 %974  ;;  %v905_v61 = vpop.xlane.xlu0 %904 }
 0x253   :  { %1431 = vst [vmem:[#allocation2 + $0x188] sm:$0xff] %v1367_v33  ;;  %v1270_v42 = vmul.f32 %v2619_v37, %v1199_v31  ;;  %1715 = vrsqrt.f32 %v1075_v43  ;;  %v1043_v36 = vmul.f32 0.0078125, %v975_v34  ;;  %v1008_v48 = vmul.f32 0.0078125, %v905_v61  ;;  %v2905_v31 = vld [vmem:[#allocation5_spill] sm:$0xff] }
 0x254   :  { %v1704_v3 = vpop.eup %1703  ;;  %1404 = vst [vmem:[#allocation2 + $0xb0] sm:$0xff] %v1340_v41  ;;  %v1301_v8 = vmul.f32 %v2619_v37, %v1230_v28  ;;  %1717 = vrsqrt.f32 %v1106_v57 }
 0x255   :  { %v1706_v4 = vpop.eup %1705  ;;  %v1341_v22 = vadd.f32 %v2625_v9, %v1270_v42  ;;  %v1231_v54 = vmul.f32 %v1704_v3, %v2510_v62  ;;  %v1107_v40 = vadd.f32 1e-06, %v1043_v36  ;;  %v1072_v59 = vadd.f32 1e-06, %v1008_v48 }
 0x256   :  { %v1372_v5 = vadd.f32 %v2625_v9, %v1301_v8  ;;  %v1196_v27 = vmul.f32 %v1706_v4, %v2515_v0  ;;  %v907_v14 = vpop.xlane.xlu1 %906  ;;  %v969_v32 = vpop.xlane.xlu0 %968  ;;  %v2906_v8 = vld [vmem:[#allocation6_spill] sm:$0xff] }
 0x257   :  { %1405 = vst [vmem:[#allocation2 + $0xb8] sm:$0xff] %v1341_v22  ;;  %v1302_v15 = vmul.f32 %v2619_v37, %v1231_v54  ;;  %1719 = vrsqrt.f32 %v1107_v40  ;;  %v1009_v26 = vmul.f32 0.0078125, %v907_v14  ;;  %v1040_v19 = vmul.f32 0.0078125, %v969_v32 }
 0x258   :  { %v1708_v24 = vpop.eup %1707  ;;  %1436 = vst [vmem:[#allocation2 + $0x1b0] sm:$0xff] %v1372_v5  ;;  %v1267_v18 = vmul.f32 %v2619_v37, %v1196_v27  ;;  %1721 = vrsqrt.f32 %v1072_v59  ;;  %v2907_v59 = vld [vmem:[#allocation7_spill] sm:$0xff] }
 0x259   :  { %v1710_v62 = vpop.eup %1709  ;;  %v1373_v1 = vadd.f32 %v2625_v9, %v1302_v15  ;;  %v1197_v25 = vmul.f32 %v1708_v24, %v2900_v56  ;;  %v1073_v35 = vadd.f32 1e-06, %v1009_v26  ;;  %v1104_v0 = vadd.f32 1e-06, %v1040_v19 }
 0x25a   :  { %v1338_v38 = vadd.f32 %v2625_v9, %v1267_v18  ;;  %v1228_v60 = vmul.f32 %v1710_v62, %v2901_v21  ;;  %v971_v7 = vpop.xlane.xlu1 %970  ;;  %v917_v11 = vpop.xlane.xlu0 %916 }
 0x25b   :  { %1437 = vst [vmem:[#allocation2 + $0x1b8] sm:$0xff] %v1373_v1  ;;  %v1268_v45 = vmul.f32 %v2619_v37, %v1197_v25  ;;  %1723 = vrsqrt.f32 %v1073_v35  ;;  %v1041_v13 = vmul.f32 0.0078125, %v971_v7  ;;  %v1014_v39 = vmul.f32 0.0078125, %v917_v11  ;;  %v2908_v1 = vld [vmem:[#allocation8_spill] sm:$0xff] }
 0x25c   :  { %v1712_v63 = vpop.eup %1711  ;;  %1402 = vst [vmem:[#allocation2 + $0xa0] sm:$0xff] %v1338_v38  ;;  %v1299_v30 = vmul.f32 %v2619_v37, %v1228_v60  ;;  %1725 = vrsqrt.f32 %v1104_v0  ;;  %v2909_v38 = vld [vmem:[#allocation9_spill] sm:$0xff] }
 0x25d   :  { %v1714_v53 = vpop.eup %1713  ;;  %v1339_v17 = vadd.f32 %v2625_v9, %v1268_v45  ;;  %v1229_v44 = vmul.f32 %v1712_v63, %v2902_v49  ;;  %v1105_v51 = vadd.f32 1e-06, %v1041_v13  ;;  %v1078_v20 = vadd.f32 1e-06, %v1014_v39 }
 0x25e   :  { %v1370_v2 = vadd.f32 %v2625_v9, %v1299_v30  ;;  %v1202_v46 = vmul.f32 %v1714_v53, %v2903_v29  ;;  %v919_v55 = vpop.xlane.xlu1 %918 }
 0x25f   :  { %1403 = vst [vmem:[#allocation2 + $0xa8] sm:$0xff] %v1339_v17  ;;  %v1300_v58 = vmul.f32 %v2619_v37, %v1229_v44  ;;  %1727 = vrsqrt.f32 %v1105_v51  ;;  %v1015_v16 = vmul.f32 0.0078125, %v919_v55  ;;  %v2910_v17 = vld [vmem:[#allocation10_spill] sm:$0xff] }
 0x260   :  { %v1716_v23 = vpop.eup %1715  ;;  %1434 = vst [vmem:[#allocation2 + $0x1a0] sm:$0xff] %v1370_v2  ;;  %v1273_v6 = vmul.f32 %v2619_v37, %v1202_v46  ;;  %1729 = vrsqrt.f32 %v1078_v20  ;;  %v2911_v2 = vld [vmem:[#allocation11_spill] sm:$0xff] }
 0x261   :  { %v1718_v12 = vpop.eup %1717  ;;  %v1371_v10 = vadd.f32 %v2625_v9, %v1300_v58  ;;  %v1203_v52 = vmul.f32 %v1716_v23, %v2904_v50  ;;  %v1079_v47 = vadd.f32 1e-06, %v1015_v16  ;;  %v2912_v23 = vld [vmem:[#allocation12_spill] sm:$0xff] }
 0x262   :  { %v1344_v33 = vadd.f32 %v2625_v9, %v1273_v6  ;;  %v1234_v43 = vmul.f32 %v1718_v12, %v2905_v31  ;;  %v915_v57 = vpop.xlane.xlu1 %914  ;;  %v913_v41 = vpop.xlane.xlu0 %912  ;;  %v2913_v31 = vld [vmem:[#allocation16_spill] sm:$0xff] }
 0x263   :  { %1435 = vst [vmem:[#allocation2 + $0x1a8] sm:$0xff] %v1371_v10  ;;  %v1274_v28 = vmul.f32 %v2619_v37, %v1203_v52  ;;  %1731 = vrsqrt.f32 %v1079_v47  ;;  %v1013_v34 = vmul.f32 0.0078125, %v915_v57  ;;  %v1012_v61 = vmul.f32 0.0078125, %v913_v41  ;;  %v1745_v10 = vld [vmem:[%s2817_s3] ss:$0 sm:$0xff]  ;;  %s1769_s3 = smov [#allocation2]  }
 0x264   :  { %v1720_v42 = vpop.eup %1719  ;;  %1408 = vst [vmem:[#allocation2 + $0xd0] sm:$0xff] %v1344_v33  ;;  %v1305_v36 = vmul.f32 %v2619_v37, %v1234_v43  ;;  %v2914_v43 = vld [vmem:[#allocation15_spill] sm:$0xff] }
 0x265   :  { %v1722_v48 = vpop.eup %1721  ;;  %v1345_v3 = vadd.f32 %v2625_v9, %v1274_v28  ;;  %v1235_v4 = vmul.f32 %v1720_v42, %v2906_v8  ;;  %v1077_v22 = vadd.f32 1e-06, %v1013_v34  ;;  %v1076_v54 = vadd.f32 1e-06, %v1012_v61  ;;  %v1746_v42 = vld [vmem:[%s2818_s4] ss:$0 sm:$0xff] }
 0x266   :  { %v1376_v40 = vadd.f32 %v2625_v9, %v1305_v36  ;;  %v1200_v5 = vmul.f32 %v1722_v48, %v2907_v59  ;;  %v979_v27 = vpop.xlane.xlu1 %978  ;;  %v977_v14 = vpop.xlane.xlu0 %976  ;;  %v2915_v48 = vld [vmem:[#allocation24_spill] sm:$0xff]  ;;  %s1451_s4 = sshll.u32 %s1769_s3, 4  ;;  %s1452_s4 = int_to_ptr.vmem [resolvable:$true] %s1451_s4 }
 0x267   :  { %1409 = vst [vmem:[#allocation2 + $0xd8] sm:$0xff] %v1345_v3  ;;  %v1306_v32 = vmul.f32 %v2619_v37, %v1235_v4  ;;  %1733 = vrsqrt.f32 %v1077_v22  ;;  %v1045_v15 = vmul.f32 0.0078125, %v979_v27  ;;  %v1044_v26 = vmul.f32 0.0078125, %v977_v14  ;;  %v2916_v4 = vld [vmem:[#allocation17_spill] sm:$0xff]  ;;  %v2917_v27 = vld [vmem:[#allocation14_spill] sm:$0xff]  ;;  %s1747_s30 = scalar_lea.vmem %s1452_s4, 8192  ;;  %p1752_p1 = scmp.lt.s32.totalorder %s1452_s4, %s1452_s4 }
 0x268   :  { %v1724_v19 = vpop.eup %1723  ;;  %1440 = vst [vmem:[#allocation2 + $0x1d0] sm:$0xff] %v1376_v40  ;;  %v1271_v24 = vmul.f32 %v2619_v37, %v1200_v5  ;;  %1735 = vrsqrt.f32 %v1076_v54  ;;  %p1748_p0 = scmp.ne.s32.totalorder %s1452_s4, %s1747_s30  ;;  %p1753_p2 = scmp.lt.s32.totalorder %s1747_s30, %s1747_s30 }
 0x269   :  { %v1726_v18 = vpop.eup %1725  ;;  %v1377_v62 = vadd.f32 %v2625_v9, %v1306_v32  ;;  %v1201_v56 = vmul.f32 %v1724_v19, %v2908_v1  ;;  %v1109_v25 = vadd.f32 1e-06, %v1045_v15  ;;  %v1108_v35 = vadd.f32 1e-06, %v1044_v26  ;;  %v2918_v15 = vld [vmem:[#allocation13_spill] sm:$0xff] }
 0x26a   :  { %v1342_v0 = vadd.f32 %v2625_v9, %v1271_v24  ;;  %v1232_v21 = vmul.f32 %v1726_v18, %v2909_v38  ;;  %v983_v60 = vpop.xlane.xlu1 %982  ;;  %v981_v7 = vpop.xlane.xlu0 %980  ;;  %p1754_p3 = por %p1753_p2, %p1752_p1 }
 0x26b   :  { %1441 = vst [vmem:[#allocation2 + $0x1d8] sm:$0xff] %v1377_v62  ;;  %v1272_v11 = vmul.f32 %v2619_v37, %v1201_v56  ;;  %1737 = vrsqrt.f32 %v1109_v25  ;;  %v1047_v45 = vmul.f32 0.0078125, %v983_v60  ;;  %v1046_v13 = vmul.f32 0.0078125, %v981_v7 }
 0x26c   :  { %v1728_v39 = vpop.eup %1727  ;;  %1406 = vst [vmem:[#allocation2 + $0xc0] sm:$0xff] %v1342_v0  ;;  %v1303_v63 = vmul.f32 %v2619_v37, %v1232_v21  ;;  %1739 = vrsqrt.f32 %v1108_v35  ;;  %p1755_p4 = pnand %p1754_p3, %p1748_p0 }
 0x26d   :  { %v1730_v30 = vpop.eup %1729  ;;  %v1343_v53 = vadd.f32 %v2625_v9, %v1272_v11  ;;  %v1233_v49 = vmul.f32 %v1728_v39, %v2910_v17  ;;  %v1111_v44 = vadd.f32 1e-06, %v1047_v45  ;;  %v1110_v51 = vadd.f32 1e-06, %v1046_v13 }
 0x26e   :  { %v1374_v20 = vadd.f32 %v2625_v9, %v1303_v63  ;;  %v1206_v29 = vmul.f32 %v1730_v30, %v2911_v2 }
 0x26f   :  { %1407 = vst [vmem:[#allocation2 + $0xc8] sm:$0xff] %v1343_v53  ;;  %v1304_v46 = vmul.f32 %v2619_v37, %v1233_v49  ;;  %1741 = vrsqrt.f32 %v1111_v44 }
 0x270   :  { %v1732_v55 = vpop.eup %1731  ;;  %1438 = vst [vmem:[#allocation2 + $0x1c0] sm:$0xff] %v1374_v20  ;;  %v1277_v58 = vmul.f32 %v2619_v37, %v1206_v29  ;;  %1743 = vrsqrt.f32 %v1110_v51 }
 0x271   :  { %v1375_v16 = vadd.f32 %v2625_v9, %v1304_v46  ;;  %v1207_v6 = vmul.f32 %v1732_v55, %v2912_v23 }
 0x272   :  { %v1348_v12 = vadd.f32 %v2625_v9, %v1277_v58 }
 0x273   :  { %1439 = vst [vmem:[#allocation2 + $0x1c8] sm:$0xff] %v1375_v16  ;;  %v1278_v50 = vmul.f32 %v1745_v10, %v1207_v6 }
 0x274   :  { %v1734_v52 = vpop.eup %1733  ;;  %1412 = vst [vmem:[#allocation2 + $0xf0] sm:$0xff] %v1348_v12 }
 0x275   :  { %v1736_v47 = vpop.eup %1735  ;;  %v1349_v33 = vadd.f32 %v2625_v9, %v1278_v50  ;;  %v1205_v37 = vmul.f32 %v1734_v52, %v2913_v31 }
 0x276   :  { %v1204_v57 = vmul.f32 %v1736_v47, %v2914_v43 }
 0x277   :  { %1413 = vst [vmem:[#allocation2 + $0xf8] sm:$0xff] %v1349_v33  ;;  %v1276_v41 = vmul.f32 %v1745_v10, %v1205_v37 }
 0x278   :  { %v1738_v28 = vpop.eup %1737  ;;  %v1275_v34 = vmul.f32 %v1745_v10, %v1204_v57 }
 0x279   :  { %v1740_v61 = vpop.eup %1739  ;;  %v1347_v36 = vadd.f32 %v1746_v42, %v1276_v41  ;;  %v1237_v3 = vmul.f32 %v1738_v28, %v2915_v48 }
 0x27a   :  { %v1346_v8 = vadd.f32 %v1746_v42, %v1275_v34  ;;  %v1236_v22 = vmul.f32 %v1740_v61, %v2916_v4 }
 0x27b   :  { %1411 = vst [vmem:[#allocation2 + $0xe8] sm:$0xff] %v1347_v36  ;;  %v1308_v9 = vmul.f32 %v1745_v10, %v1237_v3 }
 0x27c   :  { %v1742_v54 = vpop.eup %1741  ;;  %1410 = vst [vmem:[#allocation2 + $0xe0] sm:$0xff] %v1346_v8  ;;  %v1307_v40 = vmul.f32 %v1745_v10, %v1236_v22 }
 0x27d   :  { %v1744_v59 = vpop.eup %1743  ;;  %v1379_v5 = vadd.f32 %v1746_v42, %v1308_v9  ;;  %v1239_v14 = vmul.f32 %v1742_v54, %v2917_v27 }
 0x27e   :  { %v1378_v32 = vadd.f32 %v1746_v42, %v1307_v40  ;;  %v1238_v26 = vmul.f32 %v1744_v59, %v2918_v15 }
 0x27f   :  { %1443 = vst [vmem:[#allocation2 + $0x1e8] sm:$0xff] %v1379_v5  ;;  %v1310_v19 = vmul.f32 %v1745_v10, %v1239_v14 }
 0x280   :  { %1442 = vst [vmem:[#allocation2 + $0x1e0] sm:$0xff] %v1378_v32  ;;  %v1309_v24 = vmul.f32 %v1745_v10, %v1238_v26 }
 0x281   :  { %v1381_v18 = vadd.f32 %v1746_v42, %v1310_v19 }
 0x282   :  { %v1380_v62 = vadd.f32 %v1746_v42, %v1309_v24 }
 0x283   :  { %1445 = vst [vmem:[#allocation2 + $0x1f8] sm:$0xff] %v1381_v18 }
 0x284   :  { %1444 = vst [vmem:[#allocation2 + $0x1f0] sm:$0xff] %v1380_v62 }
 0x285   :  { %1758 = shalt.err (!%p1755_p4)
}
 0x286   :  { %s1770_s6 = smov 128   ;;  %s1771_s7 = smov 8  }
 0x287   :  { %1457 = dma.vmem_to_hbm [thread:$0]  %s1452_s4, 8192, %s2819_s5, [#allocation3], %s1770_s6, %s1770_s6, %s1771_s7  }
 0x288   :  { %1767 = dma.done.wait [#allocation3], 8192  }
 0x289   :  { %1768 = vsyncadd [#allocation3], 4294959104 }
 0x28a   :  { %1461 = vsyncpa [#allocation3], 1 }

</bundles_post_ra>
